<compile_context>
chip_gen: v6e
topology: v6e:2x2x1
jax: 0.10.0
libtpu: 0.0.40
codegen_flags: <defaults>
</compile_context>

<pallas_src>
import numpy as np
import jax
import jax.numpy as jnp
from jax.experimental import pallas as pl
from jax.experimental.pallas import tpu as pltpu

# ---- model geometry (28x28 is forced by the 320-d flatten in the module) ----
H = W = 28
KH = KW = 5
CO1, CO1P = 10, 16            # conv1 channels, padded per-ow lane group
CO2, CO2P = 20, 32            # conv2 channels, padded per-ow lane group
OH1, OW1 = 24, 24
PH1, PW1 = 12, 12             # after 2x2 max-pool
OH2, OW2 = 8, 8
PH2, PW2 = 4, 4
FC1, FC1P = 50, 64
NCLS, NCLSP = 10, 128         # classes padded to one full 128-lane tile
NEG = -1e30                   # padded-logit bias -> exp() underflows to exactly 0

L1 = PW1 * CO1P               # 192: conv1/pool1 lane width, lane = w*16 + c
L2 = PW2 * CO2P               # 128: conv2/pool2 lane width, lane = w*32 + c


# ---------------------------- fused Pallas kernel ----------------------------
def _sel(nrows, ncols, parity):
    # 0/1 selection matrix S with S[i, k] = 1 iff k == 2*i + parity (row picker).
    r = jax.lax.broadcasted_iota(jnp.int32, (nrows, ncols), 0)
    c = jax.lax.broadcasted_iota(jnp.int32, (nrows, ncols), 1)
    return (c == 2 * r + parity).astype(jnp.float32)


def _fused_cnn_kernel(x_ref, b1_ref, c1b_ref, b2_ref, c2b_ref,
                      w1p_ref, f1b_ref, w2p_ref, f2b_ref,
                      out_ref, a1_scr, a2_scr):
    f32, bf16 = jnp.float32, jnp.bfloat16

    # ---- conv1 (5x5, CI=1) + 2x2 max-pool + relu ----------------------------
    # Banded weights B1[parity, dy] turn the width-convolution into a matmul
    # over the 28 input columns; even/odd output columns come from separate
    # weight sets so width-pooling is a plain elementwise max.
    acc_e = jnp.zeros((OH1, L1), f32)
    acc_o = jnp.zeros((OH1, L1), f32)
    for dy in range(KH):
        rows = x_ref[0, dy:dy + OH1, :].astype(bf16)                # (24, 28)
        acc_e += jnp.dot(rows, b1_ref[0, dy], preferred_element_type=f32)
        acc_o += jnp.dot(rows, b1_ref[1, dy], preferred_element_type=f32)
    m1 = jnp.maximum(acc_e, acc_o)                                  # pooled over W
    pe, po = _sel(PH1, OH1, 0), _sel(PH1, OH1, 1)                   # pool over H
    p1 = jnp.maximum(jnp.dot(pe, m1, preferred_element_type=f32),
                     jnp.dot(po, m1, preferred_element_type=f32))
    a1_scr[...] = jnp.maximum(p1 + c1b_ref[...], 0.0)               # (12, 192)

    # ---- conv2 (5x5, CI=10) + 2x2 max-pool + relu ---------------------------
    # TODO(synk): Dropout2d / Dropout treated as identity (eval-mode forward).
    acc_e = jnp.zeros((OH2, L2), f32)
    acc_o = jnp.zeros((OH2, L2), f32)
    for dy in range(KH):
        rows = a1_scr[dy:dy + OH2, :].astype(bf16)                  # (8, 192)
        acc_e += jnp.dot(rows, b2_ref[0, dy], preferred_element_type=f32)
        acc_o += jnp.dot(rows, b2_ref[1, dy], preferred_element_type=f32)
    m2 = jnp.maximum(acc_e, acc_o)
    pe, po = _sel(PH2, OH2, 0), _sel(PH2, OH2, 1)
    p2 = jnp.maximum(jnp.dot(pe, m2, preferred_element_type=f32),
                     jnp.dot(po, m2, preferred_element_type=f32))
    a2_scr[...] = jnp.maximum(p2 + c2b_ref[...], 0.0)               # (4, 128)

    # ---- fc1 + relu: torch's (C,H,W) flatten order is folded into W1p -------
    y = f1b_ref[...]                                                # (1, 64)
    for h in range(PH2):
        y = y + jnp.dot(a2_scr[h:h + 1, :].astype(bf16), w1p_ref[h],
                        preferred_element_type=f32)
    y = jnp.maximum(y, 0.0)

    # ---- fc2 + log_softmax over the padded 128-lane class dim ---------------
    z = jnp.dot(y.astype(bf16), w2p_ref[...], preferred_element_type=f32)
    z = z + f2b_ref[...]                                            # pads at -1e30
    zmax = jnp.max(z, axis=1, keepdims=True)
    s = z - zmax
    lse = jnp.log(jnp.sum(jnp.exp(s), axis=1, keepdims=True))
    out_ref[0] = s - lse                                            # lane-dense (1,128)


# --------------------- one-time parameter preparation ------------------------
def prepare_params(p):
    w1 = np.asarray(p["conv1_w"], np.float32)        # (10, 1, 5, 5)
    b1 = np.asarray(p["conv1_b"], np.float32)
    w2 = np.asarray(p["conv2_w"], np.float32)        # (20, 10, 5, 5)
    b2 = np.asarray(p["conv2_b"], np.float32)
    fw1 = np.asarray(p["fc1_w"], np.float32)         # (50, 320)
    fb1 = np.asarray(p["fc1_b"], np.float32)
    fw2 = np.asarray(p["fc2_w"], np.float32)         # (10, 50)
    fb2 = np.asarray(p["fc2_b"], np.float32)

    # Banded conv1 weights: B1[par, dy, iw, j*16+co] = w1[co,0,dy,iw-(2j+par)]
    B1 = np.zeros((2, KH, W, L1), np.float32)
    for par in range(2):
        for dy in range(KH):
            for j in range(PW1):
                for dx in range(KW):
                    iw = 2 * j + par + dx
                    B1[par, dy, iw, j * CO1P:j * CO1P + CO1] = w1[:, 0, dy, dx]

    # Banded conv2 weights: rows = iw*16+ci, cols = j*32+co
    B2 = np.zeros((2, KH, L1, L2), np.float32)
    for par in range(2):
        for dy in range(KH):
            for j in range(PW2):
                for dx in range(KW):
                    iw = 2 * j + par + dx
                    B2[par, dy, iw * CO1P:iw * CO1P + CO1,
                       j * CO2P:j * CO2P + CO2] = w2[:, :, dy, dx].T

    # Conv bias broadcast vectors over the (w, c) interleaved lane layout.
    c1b = np.zeros((PW1, CO1P), np.float32); c1b[:, :CO1] = b1
    c2b = np.zeros((PW2, CO2P), np.float32); c2b[:, :CO2] = b2

    # fc1 weights permuted so lane = w*32 + c, sublane index = h matches the
    # kernel's pooled activation layout; torch flatten index = c*16 + h*4 + w.
    t = np.transpose(fw1.reshape(FC1, CO2, PH2, PW2), (2, 3, 1, 0))  # (h,w,c,j)
    W1p = np.zeros((PH2, PW2, CO2P, FC1P), np.float32)
    W1p[:, :, :CO2, :FC1] = t
    W1p = W1p.reshape(PH2, L2, FC1P)
    f1b = np.zeros((1, FC1P), np.float32); f1b[0, :FC1] = fb1

    W2p = np.zeros((FC1P, NCLSP), np.float32); W2p[:FC1, :NCLS] = fw2.T
    f2b = np.full((1, NCLSP), NEG, np.float32); f2b[0, :NCLS] = fb2

    bf = jnp.bfloat16
    return {
        "B1": jnp.asarray(B1, bf), "c1b": jnp.asarray(c1b.reshape(1, L1)),
        "B2": jnp.asarray(B2, bf), "c2b": jnp.asarray(c2b.reshape(1, L2)),
        "W1p": jnp.asarray(W1p, bf), "f1b": jnp.asarray(f1b),
        "W2p": jnp.asarray(W2p, bf), "f2b": jnp.asarray(f2b),
    }


# ------------------------------- forward pass --------------------------------
def cnn_forward(prep, x_nchw):
    n = x_nchw.shape[0]
    x = x_nchw.reshape(n, H, W).astype(jnp.float32)

    def full_spec(a):
        zeros = (0,) * a.ndim
        return pl.BlockSpec(a.shape, lambda i, _z=zeros: _z)   # resident across grid

    weights = (prep["B1"], prep["c1b"], prep["B2"], prep["c2b"],
               prep["W1p"], prep["f1b"], prep["W2p"], prep["f2b"])

    out = pl.pallas_call(
        _fused_cnn_kernel,
        out_shape=jax.ShapeDtypeStruct((n, 1, NCLSP), jnp.float32),
        grid=(n,),
        in_specs=[pl.BlockSpec((1, H, W), lambda i: (i, 0, 0))]
                 + [full_spec(w) for w in weights],
        out_specs=pl.BlockSpec((1, 1, NCLSP), lambda i: (i, 0, 0)),
        scratch_shapes=[pltpu.VMEM((PH1, L1), jnp.float32),
                        pltpu.VMEM((PH2, L2), jnp.float32)],
        compiler_params=pltpu.CompilerParams(
            dimension_semantics=("parallel",)),
    )(x, *weights)
    return out[:, 0, :NCLS]


# ----------------------------- init & test harness ---------------------------
def init_params(key):
    ks = jax.random.split(key, 8)

    def u(k, shape, fan_in):
        bound = 1.0 / jnp.sqrt(jnp.float32(fan_in))
        return jax.random.uniform(k, shape, jnp.float32, -bound, bound)

    return {
        "conv1_w": u(ks[0], (10, 1, 5, 5), 1 * 5 * 5),
        "conv1_b": u(ks[1], (10,), 1 * 5 * 5),
        "conv2_w": u(ks[2], (20, 10, 5, 5), 10 * 5 * 5),
        "conv2_b": u(ks[3], (20,), 10 * 5 * 5),
        "fc1_w": u(ks[4], (50, 320), 320),
        "fc1_b": u(ks[5], (50,), 320),
        "fc2_w": u(ks[6], (10, 50), 50),
        "fc2_b": u(ks[7], (10,), 50),
    }


if __name__ == "__main__":
    key = jax.random.PRNGKey(0)
    pkey, xkey = jax.random.split(key)
    params = init_params(pkey)
    prep = prepare_params(params)          # one-time weight prep, outside jit

    # MNIST-shaped NCHW input (28x28 is forced by the 320-d flatten).
    x = jax.random.normal(xkey, (2, 1, 28, 28), jnp.float32)
    out = jax.jit(cnn_forward)(prep, x)
    out = jax.block_until_ready(out)

    assert out.shape == (2, 10)
    assert bool(jnp.all(jnp.isfinite(out)))
    # rows of log_softmax must exponentiate-sum to 1
    assert jnp.allclose(jnp.sum(jnp.exp(out), axis=1), 1.0, atol=1e-4)
    print("KERNEL_OK")
</pallas_src>

<mosaic_0001>
module attributes {stable_mosaic.version = 11 : i64} {
  func.func @_fused_cnn_kernel(%arg0: i32, %arg1: memref<1x28x28xf32, #tpu.memory_space<vmem>>, %arg2: memref<2x5x28x192xbf16, #tpu.memory_space<vmem>>, %arg3: memref<1x192xf32, #tpu.memory_space<vmem>>, %arg4: memref<2x5x192x128xbf16, #tpu.memory_space<vmem>>, %arg5: memref<1x128xf32, #tpu.memory_space<vmem>>, %arg6: memref<4x128x64xbf16, #tpu.memory_space<vmem>>, %arg7: memref<1x64xf32, #tpu.memory_space<vmem>>, %arg8: memref<64x128xbf16, #tpu.memory_space<vmem>>, %arg9: memref<1x128xf32, #tpu.memory_space<vmem>>, %arg10: memref<1x1x128xf32, #tpu.memory_space<vmem>>, %arg11: memref<12x192xf32, #tpu.memory_space<vmem>>, %arg12: memref<4x128xf32, #tpu.memory_space<vmem>>) attributes {dimension_semantics = [#tpu.dimension_semantics<parallel>], iteration_bounds = array<i64: 2>, scalar_prefetch = 0 : i64, scratch_operands = 2 : i64, tpu.core_type = #tpu.core_type<tc>, window_params = [{transform_indices = @transform_0, window_bounds = array<i64: 1, 28, 28>}, {pipeline_mode = #tpu.pipeline_mode<synchronous>, transform_indices = @transform_1, window_bounds = array<i64: 2, 5, 28, 192>}, {pipeline_mode = #tpu.pipeline_mode<synchronous>, transform_indices = @transform_2, window_bounds = array<i64: 1, 192>}, {pipeline_mode = #tpu.pipeline_mode<synchronous>, transform_indices = @transform_3, window_bounds = array<i64: 2, 5, 192, 128>}, {pipeline_mode = #tpu.pipeline_mode<synchronous>, transform_indices = @transform_4, window_bounds = array<i64: 1, 128>}, {pipeline_mode = #tpu.pipeline_mode<synchronous>, transform_indices = @transform_5, window_bounds = array<i64: 4, 128, 64>}, {pipeline_mode = #tpu.pipeline_mode<synchronous>, transform_indices = @transform_6, window_bounds = array<i64: 1, 64>}, {pipeline_mode = #tpu.pipeline_mode<synchronous>, transform_indices = @transform_7, window_bounds = array<i64: 64, 128>}, {pipeline_mode = #tpu.pipeline_mode<synchronous>, transform_indices = @transform_8, window_bounds = array<i64: 1, 128>}, {transform_indices = @transform_9, window_bounds = array<i64: 1, 1, 128>}]} {
    %cst = arith.constant 0.000000e+00 : f32
    %0 = vector.broadcast %cst : f32 to vector<24x192xf32>
    %cst_0 = arith.constant 0.000000e+00 : f32
    %1 = vector.broadcast %cst_0 : f32 to vector<24x192xf32>
    %c0 = arith.constant 0 : index
    %c0_1 = arith.constant 0 : index
    %c0_2 = arith.constant 0 : index
    %2 = vector.load %arg1[%c0, %c0_1, %c0_2] : memref<1x28x28xf32, #tpu.memory_space<vmem>>, vector<1x24x28xf32>
    %3 = vector.shape_cast %2 : vector<1x24x28xf32> to vector<24x28xf32>
    %4 = arith.truncf %3 : vector<24x28xf32> to vector<24x28xbf16>
    %c0_3 = arith.constant 0 : index
    %c0_4 = arith.constant 0 : index
    %c0_5 = arith.constant 0 : index
    %c0_6 = arith.constant 0 : index
    %5 = vector.load %arg2[%c0_3, %c0_4, %c0_5, %c0_6] : memref<2x5x28x192xbf16, #tpu.memory_space<vmem>>, vector<1x1x28x192xbf16>
    %6 = vector.shape_cast %5 : vector<1x1x28x192xbf16> to vector<28x192xbf16>
    %cst_7 = arith.constant dense<0.000000e+00> : vector<24x192xf32>
    %7 = tpu.matmul %4, %6, %cst_7 {dimension_numbers = #tpu.dot_dimension_numbers<[1], [0], [0], [1], [0, 0, 1, 1], [], []>} : vector<24x28xbf16>, vector<28x192xbf16>, vector<24x192xf32> -> vector<24x192xf32>
    %8 = arith.addf %0, %7 : vector<24x192xf32>
    %c1 = arith.constant 1 : index
    %c0_8 = arith.constant 0 : index
    %c0_9 = arith.constant 0 : index
    %c0_10 = arith.constant 0 : index
    %9 = vector.load %arg2[%c1, %c0_8, %c0_9, %c0_10] : memref<2x5x28x192xbf16, #tpu.memory_space<vmem>>, vector<1x1x28x192xbf16>
    %10 = vector.shape_cast %9 : vector<1x1x28x192xbf16> to vector<28x192xbf16>
    %cst_11 = arith.constant dense<0.000000e+00> : vector<24x192xf32>
    %11 = tpu.matmul %4, %10, %cst_11 {dimension_numbers = #tpu.dot_dimension_numbers<[1], [0], [0], [1], [0, 0, 1, 1], [], []>} : vector<24x28xbf16>, vector<28x192xbf16>, vector<24x192xf32> -> vector<24x192xf32>
    %12 = arith.addf %1, %11 : vector<24x192xf32>
    %c0_12 = arith.constant 0 : index
    %c1_13 = arith.constant 1 : index
    %c0_14 = arith.constant 0 : index
    %13 = vector.load %arg1[%c0_12, %c1_13, %c0_14] : memref<1x28x28xf32, #tpu.memory_space<vmem>>, vector<1x24x28xf32>
    %14 = vector.shape_cast %13 : vector<1x24x28xf32> to vector<24x28xf32>
    %15 = arith.truncf %14 : vector<24x28xf32> to vector<24x28xbf16>
    %c0_15 = arith.constant 0 : index
    %c1_16 = arith.constant 1 : index
    %c0_17 = arith.constant 0 : index
    %c0_18 = arith.constant 0 : index
    %16 = vector.load %arg2[%c0_15, %c1_16, %c0_17, %c0_18] : memref<2x5x28x192xbf16, #tpu.memory_space<vmem>>, vector<1x1x28x192xbf16>
    %17 = vector.shape_cast %16 : vector<1x1x28x192xbf16> to vector<28x192xbf16>
    %cst_19 = arith.constant dense<0.000000e+00> : vector<24x192xf32>
    %18 = tpu.matmul %15, %17, %cst_19 {dimension_numbers = #tpu.dot_dimension_numbers<[1], [0], [0], [1], [0, 0, 1, 1], [], []>} : vector<24x28xbf16>, vector<28x192xbf16>, vector<24x192xf32> -> vector<24x192xf32>
    %19 = arith.addf %8, %18 : vector<24x192xf32>
    %c1_20 = arith.constant 1 : index
    %c1_21 = arith.constant 1 : index
    %c0_22 = arith.constant 0 : index
    %c0_23 = arith.constant 0 : index
    %20 = vector.load %arg2[%c1_20, %c1_21, %c0_22, %c0_23] : memref<2x5x28x192xbf16, #tpu.memory_space<vmem>>, vector<1x1x28x192xbf16>
    %21 = vector.shape_cast %20 : vector<1x1x28x192xbf16> to vector<28x192xbf16>
    %cst_24 = arith.constant dense<0.000000e+00> : vector<24x192xf32>
    %22 = tpu.matmul %15, %21, %cst_24 {dimension_numbers = #tpu.dot_dimension_numbers<[1], [0], [0], [1], [0, 0, 1, 1], [], []>} : vector<24x28xbf16>, vector<28x192xbf16>, vector<24x192xf32> -> vector<24x192xf32>
    %23 = arith.addf %12, %22 : vector<24x192xf32>
    %c0_25 = arith.constant 0 : index
    %c2 = arith.constant 2 : index
    %c0_26 = arith.constant 0 : index
    %24 = vector.load %arg1[%c0_25, %c2, %c0_26] : memref<1x28x28xf32, #tpu.memory_space<vmem>>, vector<1x24x28xf32>
    %25 = vector.shape_cast %24 : vector<1x24x28xf32> to vector<24x28xf32>
    %26 = arith.truncf %25 : vector<24x28xf32> to vector<24x28xbf16>
    %c0_27 = arith.constant 0 : index
    %c2_28 = arith.constant 2 : index
    %c0_29 = arith.constant 0 : index
    %c0_30 = arith.constant 0 : index
    %27 = vector.load %arg2[%c0_27, %c2_28, %c0_29, %c0_30] : memref<2x5x28x192xbf16, #tpu.memory_space<vmem>>, vector<1x1x28x192xbf16>
    %28 = vector.shape_cast %27 : vector<1x1x28x192xbf16> to vector<28x192xbf16>
    %cst_31 = arith.constant dense<0.000000e+00> : vector<24x192xf32>
    %29 = tpu.matmul %26, %28, %cst_31 {dimension_numbers = #tpu.dot_dimension_numbers<[1], [0], [0], [1], [0, 0, 1, 1], [], []>} : vector<24x28xbf16>, vector<28x192xbf16>, vector<24x192xf32> -> vector<24x192xf32>
    %30 = arith.addf %19, %29 : vector<24x192xf32>
    %c1_32 = arith.constant 1 : index
    %c2_33 = arith.constant 2 : index
    %c0_34 = arith.constant 0 : index
    %c0_35 = arith.constant 0 : index
    %31 = vector.load %arg2[%c1_32, %c2_33, %c0_34, %c0_35] : memref<2x5x28x192xbf16, #tpu.memory_space<vmem>>, vector<1x1x28x192xbf16>
    %32 = vector.shape_cast %31 : vector<1x1x28x192xbf16> to vector<28x192xbf16>
    %cst_36 = arith.constant dense<0.000000e+00> : vector<24x192xf32>
    %33 = tpu.matmul %26, %32, %cst_36 {dimension_numbers = #tpu.dot_dimension_numbers<[1], [0], [0], [1], [0, 0, 1, 1], [], []>} : vector<24x28xbf16>, vector<28x192xbf16>, vector<24x192xf32> -> vector<24x192xf32>
    %34 = arith.addf %23, %33 : vector<24x192xf32>
    %c0_37 = arith.constant 0 : index
    %c3 = arith.constant 3 : index
    %c0_38 = arith.constant 0 : index
    %35 = vector.load %arg1[%c0_37, %c3, %c0_38] : memref<1x28x28xf32, #tpu.memory_space<vmem>>, vector<1x24x28xf32>
    %36 = vector.shape_cast %35 : vector<1x24x28xf32> to vector<24x28xf32>
    %37 = arith.truncf %36 : vector<24x28xf32> to vector<24x28xbf16>
    %c0_39 = arith.constant 0 : index
    %c3_40 = arith.constant 3 : index
    %c0_41 = arith.constant 0 : index
    %c0_42 = arith.constant 0 : index
    %38 = vector.load %arg2[%c0_39, %c3_40, %c0_41, %c0_42] : memref<2x5x28x192xbf16, #tpu.memory_space<vmem>>, vector<1x1x28x192xbf16>
    %39 = vector.shape_cast %38 : vector<1x1x28x192xbf16> to vector<28x192xbf16>
    %cst_43 = arith.constant dense<0.000000e+00> : vector<24x192xf32>
    %40 = tpu.matmul %37, %39, %cst_43 {dimension_numbers = #tpu.dot_dimension_numbers<[1], [0], [0], [1], [0, 0, 1, 1], [], []>} : vector<24x28xbf16>, vector<28x192xbf16>, vector<24x192xf32> -> vector<24x192xf32>
    %41 = arith.addf %30, %40 : vector<24x192xf32>
    %c1_44 = arith.constant 1 : index
    %c3_45 = arith.constant 3 : index
    %c0_46 = arith.constant 0 : index
    %c0_47 = arith.constant 0 : index
    %42 = vector.load %arg2[%c1_44, %c3_45, %c0_46, %c0_47] : memref<2x5x28x192xbf16, #tpu.memory_space<vmem>>, vector<1x1x28x192xbf16>
    %43 = vector.shape_cast %42 : vector<1x1x28x192xbf16> to vector<28x192xbf16>
    %cst_48 = arith.constant dense<0.000000e+00> : vector<24x192xf32>
    %44 = tpu.matmul %37, %43, %cst_48 {dimension_numbers = #tpu.dot_dimension_numbers<[1], [0], [0], [1], [0, 0, 1, 1], [], []>} : vector<24x28xbf16>, vector<28x192xbf16>, vector<24x192xf32> -> vector<24x192xf32>
    %45 = arith.addf %34, %44 : vector<24x192xf32>
    %c0_49 = arith.constant 0 : index
    %c4 = arith.constant 4 : index
    %c0_50 = arith.constant 0 : index
    %46 = vector.load %arg1[%c0_49, %c4, %c0_50] : memref<1x28x28xf32, #tpu.memory_space<vmem>>, vector<1x24x28xf32>
    %47 = vector.shape_cast %46 : vector<1x24x28xf32> to vector<24x28xf32>
    %48 = arith.truncf %47 : vector<24x28xf32> to vector<24x28xbf16>
    %c0_51 = arith.constant 0 : index
    %c4_52 = arith.constant 4 : index
    %c0_53 = arith.constant 0 : index
    %c0_54 = arith.constant 0 : index
    %49 = vector.load %arg2[%c0_51, %c4_52, %c0_53, %c0_54] : memref<2x5x28x192xbf16, #tpu.memory_space<vmem>>, vector<1x1x28x192xbf16>
    %50 = vector.shape_cast %49 : vector<1x1x28x192xbf16> to vector<28x192xbf16>
    %cst_55 = arith.constant dense<0.000000e+00> : vector<24x192xf32>
    %51 = tpu.matmul %48, %50, %cst_55 {dimension_numbers = #tpu.dot_dimension_numbers<[1], [0], [0], [1], [0, 0, 1, 1], [], []>} : vector<24x28xbf16>, vector<28x192xbf16>, vector<24x192xf32> -> vector<24x192xf32>
    %52 = arith.addf %41, %51 : vector<24x192xf32>
    %c1_56 = arith.constant 1 : index
    %c4_57 = arith.constant 4 : index
    %c0_58 = arith.constant 0 : index
    %c0_59 = arith.constant 0 : index
    %53 = vector.load %arg2[%c1_56, %c4_57, %c0_58, %c0_59] : memref<2x5x28x192xbf16, #tpu.memory_space<vmem>>, vector<1x1x28x192xbf16>
    %54 = vector.shape_cast %53 : vector<1x1x28x192xbf16> to vector<28x192xbf16>
    %cst_60 = arith.constant dense<0.000000e+00> : vector<24x192xf32>
    %55 = tpu.matmul %48, %54, %cst_60 {dimension_numbers = #tpu.dot_dimension_numbers<[1], [0], [0], [1], [0, 0, 1, 1], [], []>} : vector<24x28xbf16>, vector<28x192xbf16>, vector<24x192xf32> -> vector<24x192xf32>
    %56 = arith.addf %45, %55 : vector<24x192xf32>
    %57 = arith.maximumf %52, %56 : vector<24x192xf32>
    %58 = tpu.iota {dimensions = array<i32: 0>} : vector<12x24xi32>
    %59 = tpu.iota {dimensions = array<i32: 1>} : vector<12x24xi32>
    %c2_i32 = arith.constant 2 : i32
    %60 = vector.broadcast %c2_i32 : i32 to vector<12x24xi32>
    %61 = arith.muli %60, %58 : vector<12x24xi32>
    %c0_i32 = arith.constant 0 : i32
    %62 = vector.broadcast %c0_i32 : i32 to vector<12x24xi32>
    %63 = arith.addi %61, %62 : vector<12x24xi32>
    %64 = arith.cmpi eq, %59, %63 : vector<12x24xi32>
    %65 = arith.extui %64 : vector<12x24xi1> to vector<12x24xi32>
    %66 = arith.sitofp %65 : vector<12x24xi32> to vector<12x24xf32>
    %67 = tpu.iota {dimensions = array<i32: 0>} : vector<12x24xi32>
    %68 = tpu.iota {dimensions = array<i32: 1>} : vector<12x24xi32>
    %c2_i32_61 = arith.constant 2 : i32
    %69 = vector.broadcast %c2_i32_61 : i32 to vector<12x24xi32>
    %70 = arith.muli %69, %67 : vector<12x24xi32>
    %c1_i32 = arith.constant 1 : i32
    %71 = vector.broadcast %c1_i32 : i32 to vector<12x24xi32>
    %72 = arith.addi %70, %71 : vector<12x24xi32>
    %73 = arith.cmpi eq, %68, %72 : vector<12x24xi32>
    %74 = arith.extui %73 : vector<12x24xi1> to vector<12x24xi32>
    %75 = arith.sitofp %74 : vector<12x24xi32> to vector<12x24xf32>
    %cst_62 = arith.constant dense<0.000000e+00> : vector<12x192xf32>
    %76 = tpu.matmul %66, %57, %cst_62 {dimension_numbers = #tpu.dot_dimension_numbers<[1], [0], [0], [1], [0, 0, 1, 1], [], []>} : vector<12x24xf32>, vector<24x192xf32>, vector<12x192xf32> -> vector<12x192xf32>
    %cst_63 = arith.constant dense<0.000000e+00> : vector<12x192xf32>
    %77 = tpu.matmul %75, %57, %cst_63 {dimension_numbers = #tpu.dot_dimension_numbers<[1], [0], [0], [1], [0, 0, 1, 1], [], []>} : vector<12x24xf32>, vector<24x192xf32>, vector<12x192xf32> -> vector<12x192xf32>
    %78 = arith.maximumf %76, %77 : vector<12x192xf32>
    %c0_64 = arith.constant 0 : index
    %c0_65 = arith.constant 0 : index
    %79 = vector.load %arg3[%c0_64, %c0_65] : memref<1x192xf32, #tpu.memory_space<vmem>>, vector<1x192xf32>
    %80 = vector.broadcast %79 : vector<1x192xf32> to vector<12x192xf32>
    %81 = arith.addf %78, %80 : vector<12x192xf32>
    %cst_66 = arith.constant 0.000000e+00 : f32
    %82 = vector.broadcast %cst_66 : f32 to vector<12x192xf32>
    %83 = arith.maximumf %81, %82 : vector<12x192xf32>
    %c0_67 = arith.constant 0 : index
    %c0_68 = arith.constant 0 : index
    %84 = vector.load %arg11[%c0_67, %c0_68] : memref<12x192xf32, #tpu.memory_space<vmem>>, vector<12x192xf32>
    tpu.vector_store %arg11[%c0_67, %c0_68], %83 {strides = array<i32>} : memref<12x192xf32, #tpu.memory_space<vmem>>, vector<12x192xf32>,
    %cst_69 = arith.constant 0.000000e+00 : f32
    %85 = vector.broadcast %cst_69 : f32 to vector<8x128xf32>
    %cst_70 = arith.constant 0.000000e+00 : f32
    %86 = vector.broadcast %cst_70 : f32 to vector<8x128xf32>
    %c0_71 = arith.constant 0 : index
    %c0_72 = arith.constant 0 : index
    %87 = vector.load %arg11[%c0_71, %c0_72] : memref<12x192xf32, #tpu.memory_space<vmem>>, vector<8x192xf32>
    %88 = arith.truncf %87 : vector<8x192xf32> to vector<8x192xbf16>
    %c0_73 = arith.constant 0 : index
    %c0_74 = arith.constant 0 : index
    %c0_75 = arith.constant 0 : index
    %c0_76 = arith.constant 0 : index
    %89 = vector.load %arg4[%c0_73, %c0_74, %c0_75, %c0_76] : memref<2x5x192x128xbf16, #tpu.memory_space<vmem>>, vector<1x1x192x128xbf16>
    %90 = vector.shape_cast %89 : vector<1x1x192x128xbf16> to vector<192x128xbf16>
    %cst_77 = arith.constant dense<0.000000e+00> : vector<8x128xf32>
    %91 = tpu.matmul %88, %90, %cst_77 {dimension_numbers = #tpu.dot_dimension_numbers<[1], [0], [0], [1], [0, 0, 1, 1], [], []>} : vector<8x192xbf16>, vector<192x128xbf16>, vector<8x128xf32> -> vector<8x128xf32>
    %92 = arith.addf %85, %91 : vector<8x128xf32>
    %c1_78 = arith.constant 1 : index
    %c0_79 = arith.constant 0 : index
    %c0_80 = arith.constant 0 : index
    %c0_81 = arith.constant 0 : index
    %93 = vector.load %arg4[%c1_78, %c0_79, %c0_80, %c0_81] : memref<2x5x192x128xbf16, #tpu.memory_space<vmem>>, vector<1x1x192x128xbf16>
    %94 = vector.shape_cast %93 : vector<1x1x192x128xbf16> to vector<192x128xbf16>
    %cst_82 = arith.constant dense<0.000000e+00> : vector<8x128xf32>
    %95 = tpu.matmul %88, %94, %cst_82 {dimension_numbers = #tpu.dot_dimension_numbers<[1], [0], [0], [1], [0, 0, 1, 1], [], []>} : vector<8x192xbf16>, vector<192x128xbf16>, vector<8x128xf32> -> vector<8x128xf32>
    %96 = arith.addf %86, %95 : vector<8x128xf32>
    %c1_83 = arith.constant 1 : index
    %c0_84 = arith.constant 0 : index
    %97 = vector.load %arg11[%c1_83, %c0_84] : memref<12x192xf32, #tpu.memory_space<vmem>>, vector<8x192xf32>
    %98 = arith.truncf %97 : vector<8x192xf32> to vector<8x192xbf16>
    %c0_85 = arith.constant 0 : index
    %c1_86 = arith.constant 1 : index
    %c0_87 = arith.constant 0 : index
    %c0_88 = arith.constant 0 : index
    %99 = vector.load %arg4[%c0_85, %c1_86, %c0_87, %c0_88] : memref<2x5x192x128xbf16, #tpu.memory_space<vmem>>, vector<1x1x192x128xbf16>
    %100 = vector.shape_cast %99 : vector<1x1x192x128xbf16> to vector<192x128xbf16>
    %cst_89 = arith.constant dense<0.000000e+00> : vector<8x128xf32>
    %101 = tpu.matmul %98, %100, %cst_89 {dimension_numbers = #tpu.dot_dimension_numbers<[1], [0], [0], [1], [0, 0, 1, 1], [], []>} : vector<8x192xbf16>, vector<192x128xbf16>, vector<8x128xf32> -> vector<8x128xf32>
    %102 = arith.addf %92, %101 : vector<8x128xf32>
    %c1_90 = arith.constant 1 : index
    %c1_91 = arith.constant 1 : index
    %c0_92 = arith.constant 0 : index
    %c0_93 = arith.constant 0 : index
    %103 = vector.load %arg4[%c1_90, %c1_91, %c0_92, %c0_93] : memref<2x5x192x128xbf16, #tpu.memory_space<vmem>>, vector<1x1x192x128xbf16>
    %104 = vector.shape_cast %103 : vector<1x1x192x128xbf16> to vector<192x128xbf16>
    %cst_94 = arith.constant dense<0.000000e+00> : vector<8x128xf32>
    %105 = tpu.matmul %98, %104, %cst_94 {dimension_numbers = #tpu.dot_dimension_numbers<[1], [0], [0], [1], [0, 0, 1, 1], [], []>} : vector<8x192xbf16>, vector<192x128xbf16>, vector<8x128xf32> -> vector<8x128xf32>
    %106 = arith.addf %96, %105 : vector<8x128xf32>
    %c2_95 = arith.constant 2 : index
    %c0_96 = arith.constant 0 : index
    %107 = vector.load %arg11[%c2_95, %c0_96] : memref<12x192xf32, #tpu.memory_space<vmem>>, vector<8x192xf32>
    %108 = arith.truncf %107 : vector<8x192xf32> to vector<8x192xbf16>
    %c0_97 = arith.constant 0 : index
    %c2_98 = arith.constant 2 : index
    %c0_99 = arith.constant 0 : index
    %c0_100 = arith.constant 0 : index
    %109 = vector.load %arg4[%c0_97, %c2_98, %c0_99, %c0_100] : memref<2x5x192x128xbf16, #tpu.memory_space<vmem>>, vector<1x1x192x128xbf16>
    %110 = vector.shape_cast %109 : vector<1x1x192x128xbf16> to vector<192x128xbf16>
    %cst_101 = arith.constant dense<0.000000e+00> : vector<8x128xf32>
    %111 = tpu.matmul %108, %110, %cst_101 {dimension_numbers = #tpu.dot_dimension_numbers<[1], [0], [0], [1], [0, 0, 1, 1], [], []>} : vector<8x192xbf16>, vector<192x128xbf16>, vector<8x128xf32> -> vector<8x128xf32>
    %112 = arith.addf %102, %111 : vector<8x128xf32>
    %c1_102 = arith.constant 1 : index
    %c2_103 = arith.constant 2 : index
    %c0_104 = arith.constant 0 : index
    %c0_105 = arith.constant 0 : index
    %113 = vector.load %arg4[%c1_102, %c2_103, %c0_104, %c0_105] : memref<2x5x192x128xbf16, #tpu.memory_space<vmem>>, vector<1x1x192x128xbf16>
    %114 = vector.shape_cast %113 : vector<1x1x192x128xbf16> to vector<192x128xbf16>
    %cst_106 = arith.constant dense<0.000000e+00> : vector<8x128xf32>
    %115 = tpu.matmul %108, %114, %cst_106 {dimension_numbers = #tpu.dot_dimension_numbers<[1], [0], [0], [1], [0, 0, 1, 1], [], []>} : vector<8x192xbf16>, vector<192x128xbf16>, vector<8x128xf32> -> vector<8x128xf32>
    %116 = arith.addf %106, %115 : vector<8x128xf32>
    %c3_107 = arith.constant 3 : index
    %c0_108 = arith.constant 0 : index
    %117 = vector.load %arg11[%c3_107, %c0_108] : memref<12x192xf32, #tpu.memory_space<vmem>>, vector<8x192xf32>
    %118 = arith.truncf %117 : vector<8x192xf32> to vector<8x192xbf16>
    %c0_109 = arith.constant 0 : index
    %c3_110 = arith.constant 3 : index
    %c0_111 = arith.constant 0 : index
    %c0_112 = arith.constant 0 : index
    %119 = vector.load %arg4[%c0_109, %c3_110, %c0_111, %c0_112] : memref<2x5x192x128xbf16, #tpu.memory_space<vmem>>, vector<1x1x192x128xbf16>
    %120 = vector.shape_cast %119 : vector<1x1x192x128xbf16> to vector<192x128xbf16>
    %cst_113 = arith.constant dense<0.000000e+00> : vector<8x128xf32>
    %121 = tpu.matmul %118, %120, %cst_113 {dimension_numbers = #tpu.dot_dimension_numbers<[1], [0], [0], [1], [0, 0, 1, 1], [], []>} : vector<8x192xbf16>, vector<192x128xbf16>, vector<8x128xf32> -> vector<8x128xf32>
    %122 = arith.addf %112, %121 : vector<8x128xf32>
    %c1_114 = arith.constant 1 : index
    %c3_115 = arith.constant 3 : index
    %c0_116 = arith.constant 0 : index
    %c0_117 = arith.constant 0 : index
    %123 = vector.load %arg4[%c1_114, %c3_115, %c0_116, %c0_117] : memref<2x5x192x128xbf16, #tpu.memory_space<vmem>>, vector<1x1x192x128xbf16>
    %124 = vector.shape_cast %123 : vector<1x1x192x128xbf16> to vector<192x128xbf16>
    %cst_118 = arith.constant dense<0.000000e+00> : vector<8x128xf32>
    %125 = tpu.matmul %118, %124, %cst_118 {dimension_numbers = #tpu.dot_dimension_numbers<[1], [0], [0], [1], [0, 0, 1, 1], [], []>} : vector<8x192xbf16>, vector<192x128xbf16>, vector<8x128xf32> -> vector<8x128xf32>
    %126 = arith.addf %116, %125 : vector<8x128xf32>
    %c4_119 = arith.constant 4 : index
    %c0_120 = arith.constant 0 : index
    %127 = vector.load %arg11[%c4_119, %c0_120] : memref<12x192xf32, #tpu.memory_space<vmem>>, vector<8x192xf32>
    %128 = arith.truncf %127 : vector<8x192xf32> to vector<8x192xbf16>
    %c0_121 = arith.constant 0 : index
    %c4_122 = arith.constant 4 : index
    %c0_123 = arith.constant 0 : index
    %c0_124 = arith.constant 0 : index
    %129 = vector.load %arg4[%c0_121, %c4_122, %c0_123, %c0_124] : memref<2x5x192x128xbf16, #tpu.memory_space<vmem>>, vector<1x1x192x128xbf16>
    %130 = vector.shape_cast %129 : vector<1x1x192x128xbf16> to vector<192x128xbf16>
    %cst_125 = arith.constant dense<0.000000e+00> : vector<8x128xf32>
    %131 = tpu.matmul %128, %130, %cst_125 {dimension_numbers = #tpu.dot_dimension_numbers<[1], [0], [0], [1], [0, 0, 1, 1], [], []>} : vector<8x192xbf16>, vector<192x128xbf16>, vector<8x128xf32> -> vector<8x128xf32>
    %132 = arith.addf %122, %131 : vector<8x128xf32>
    %c1_126 = arith.constant 1 : index
    %c4_127 = arith.constant 4 : index
    %c0_128 = arith.constant 0 : index
    %c0_129 = arith.constant 0 : index
    %133 = vector.load %arg4[%c1_126, %c4_127, %c0_128, %c0_129] : memref<2x5x192x128xbf16, #tpu.memory_space<vmem>>, vector<1x1x192x128xbf16>
    %134 = vector.shape_cast %133 : vector<1x1x192x128xbf16> to vector<192x128xbf16>
    %cst_130 = arith.constant dense<0.000000e+00> : vector<8x128xf32>
    %135 = tpu.matmul %128, %134, %cst_130 {dimension_numbers = #tpu.dot_dimension_numbers<[1], [0], [0], [1], [0, 0, 1, 1], [], []>} : vector<8x192xbf16>, vector<192x128xbf16>, vector<8x128xf32> -> vector<8x128xf32>
    %136 = arith.addf %126, %135 : vector<8x128xf32>
    %137 = arith.maximumf %132, %136 : vector<8x128xf32>
    %138 = tpu.iota {dimensions = array<i32: 0>} : vector<4x8xi32>
    %139 = tpu.iota {dimensions = array<i32: 1>} : vector<4x8xi32>
    %c2_i32_131 = arith.constant 2 : i32
    %140 = vector.broadcast %c2_i32_131 : i32 to vector<4x8xi32>
    %141 = arith.muli %140, %138 : vector<4x8xi32>
    %c0_i32_132 = arith.constant 0 : i32
    %142 = vector.broadcast %c0_i32_132 : i32 to vector<4x8xi32>
    %143 = arith.addi %141, %142 : vector<4x8xi32>
    %144 = arith.cmpi eq, %139, %143 : vector<4x8xi32>
    %145 = arith.extui %144 : vector<4x8xi1> to vector<4x8xi32>
    %146 = arith.sitofp %145 : vector<4x8xi32> to vector<4x8xf32>
    %147 = tpu.iota {dimensions = array<i32: 0>} : vector<4x8xi32>
    %148 = tpu.iota {dimensions = array<i32: 1>} : vector<4x8xi32>
    %c2_i32_133 = arith.constant 2 : i32
    %149 = vector.broadcast %c2_i32_133 : i32 to vector<4x8xi32>
    %150 = arith.muli %149, %147 : vector<4x8xi32>
    %c1_i32_134 = arith.constant 1 : i32
    %151 = vector.broadcast %c1_i32_134 : i32 to vector<4x8xi32>
    %152 = arith.addi %150, %151 : vector<4x8xi32>
    %153 = arith.cmpi eq, %148, %152 : vector<4x8xi32>
    %154 = arith.extui %153 : vector<4x8xi1> to vector<4x8xi32>
    %155 = arith.sitofp %154 : vector<4x8xi32> to vector<4x8xf32>
    %cst_135 = arith.constant dense<0.000000e+00> : vector<4x128xf32>
    %156 = tpu.matmul %146, %137, %cst_135 {dimension_numbers = #tpu.dot_dimension_numbers<[1], [0], [0], [1], [0, 0, 1, 1], [], []>} : vector<4x8xf32>, vector<8x128xf32>, vector<4x128xf32> -> vector<4x128xf32>
    %cst_136 = arith.constant dense<0.000000e+00> : vector<4x128xf32>
    %157 = tpu.matmul %155, %137, %cst_136 {dimension_numbers = #tpu.dot_dimension_numbers<[1], [0], [0], [1], [0, 0, 1, 1], [], []>} : vector<4x8xf32>, vector<8x128xf32>, vector<4x128xf32> -> vector<4x128xf32>
    %158 = arith.maximumf %156, %157 : vector<4x128xf32>
    %c0_137 = arith.constant 0 : index
    %c0_138 = arith.constant 0 : index
    %159 = vector.load %arg5[%c0_137, %c0_138] : memref<1x128xf32, #tpu.memory_space<vmem>>, vector<1x128xf32>
    %160 = vector.broadcast %159 : vector<1x128xf32> to vector<4x128xf32>
    %161 = arith.addf %158, %160 : vector<4x128xf32>
    %cst_139 = arith.constant 0.000000e+00 : f32
    %162 = vector.broadcast %cst_139 : f32 to vector<4x128xf32>
    %163 = arith.maximumf %161, %162 : vector<4x128xf32>
    %c0_140 = arith.constant 0 : index
    %c0_141 = arith.constant 0 : index
    %164 = vector.load %arg12[%c0_140, %c0_141] : memref<4x128xf32, #tpu.memory_space<vmem>>, vector<4x128xf32>
    tpu.vector_store %arg12[%c0_140, %c0_141], %163 {strides = array<i32>} : memref<4x128xf32, #tpu.memory_space<vmem>>, vector<4x128xf32>,
    %c0_142 = arith.constant 0 : index
    %c0_143 = arith.constant 0 : index
    %165 = vector.load %arg7[%c0_142, %c0_143] : memref<1x64xf32, #tpu.memory_space<vmem>>, vector<1x64xf32>
    %c0_144 = arith.constant 0 : index
    %c0_145 = arith.constant 0 : index
    %166 = vector.load %arg12[%c0_144, %c0_145] : memref<4x128xf32, #tpu.memory_space<vmem>>, vector<1x128xf32>
    %167 = arith.truncf %166 : vector<1x128xf32> to vector<1x128xbf16>
    %c0_146 = arith.constant 0 : index
    %c0_147 = arith.constant 0 : index
    %c0_148 = arith.constant 0 : index
    %168 = vector.load %arg6[%c0_146, %c0_147, %c0_148] : memref<4x128x64xbf16, #tpu.memory_space<vmem>>, vector<1x128x64xbf16>
    %169 = vector.shape_cast %168 : vector<1x128x64xbf16> to vector<128x64xbf16>
    %cst_149 = arith.constant dense<0.000000e+00> : vector<1x64xf32>
    %170 = tpu.matmul %167, %169, %cst_149 {dimension_numbers = #tpu.dot_dimension_numbers<[1], [0], [0], [1], [0, 0, 1, 1], [], []>} : vector<1x128xbf16>, vector<128x64xbf16>, vector<1x64xf32> -> vector<1x64xf32>
    %171 = arith.addf %165, %170 : vector<1x64xf32>
    %c1_150 = arith.constant 1 : index
    %c0_151 = arith.constant 0 : index
    %172 = vector.load %arg12[%c1_150, %c0_151] : memref<4x128xf32, #tpu.memory_space<vmem>>, vector<1x128xf32>
    %173 = arith.truncf %172 : vector<1x128xf32> to vector<1x128xbf16>
    %c1_152 = arith.constant 1 : index
    %c0_153 = arith.constant 0 : index
    %c0_154 = arith.constant 0 : index
    %174 = vector.load %arg6[%c1_152, %c0_153, %c0_154] : memref<4x128x64xbf16, #tpu.memory_space<vmem>>, vector<1x128x64xbf16>
    %175 = vector.shape_cast %174 : vector<1x128x64xbf16> to vector<128x64xbf16>
    %cst_155 = arith.constant dense<0.000000e+00> : vector<1x64xf32>
    %176 = tpu.matmul %173, %175, %cst_155 {dimension_numbers = #tpu.dot_dimension_numbers<[1], [0], [0], [1], [0, 0, 1, 1], [], []>} : vector<1x128xbf16>, vector<128x64xbf16>, vector<1x64xf32> -> vector<1x64xf32>
    %177 = arith.addf %171, %176 : vector<1x64xf32>
    %c2_156 = arith.constant 2 : index
    %c0_157 = arith.constant 0 : index
    %178 = vector.load %arg12[%c2_156, %c0_157] : memref<4x128xf32, #tpu.memory_space<vmem>>, vector<1x128xf32>
    %179 = arith.truncf %178 : vector<1x128xf32> to vector<1x128xbf16>
    %c2_158 = arith.constant 2 : index
    %c0_159 = arith.constant 0 : index
    %c0_160 = arith.constant 0 : index
    %180 = vector.load %arg6[%c2_158, %c0_159, %c0_160] : memref<4x128x64xbf16, #tpu.memory_space<vmem>>, vector<1x128x64xbf16>
    %181 = vector.shape_cast %180 : vector<1x128x64xbf16> to vector<128x64xbf16>
    %cst_161 = arith.constant dense<0.000000e+00> : vector<1x64xf32>
    %182 = tpu.matmul %179, %181, %cst_161 {dimension_numbers = #tpu.dot_dimension_numbers<[1], [0], [0], [1], [0, 0, 1, 1], [], []>} : vector<1x128xbf16>, vector<128x64xbf16>, vector<1x64xf32> -> vector<1x64xf32>
    %183 = arith.addf %177, %182 : vector<1x64xf32>
    %c3_162 = arith.constant 3 : index
    %c0_163 = arith.constant 0 : index
    %184 = vector.load %arg12[%c3_162, %c0_163] : memref<4x128xf32, #tpu.memory_space<vmem>>, vector<1x128xf32>
    %185 = arith.truncf %184 : vector<1x128xf32> to vector<1x128xbf16>
    %c3_164 = arith.constant 3 : index
    %c0_165 = arith.constant 0 : index
    %c0_166 = arith.constant 0 : index
    %186 = vector.load %arg6[%c3_164, %c0_165, %c0_166] : memref<4x128x64xbf16, #tpu.memory_space<vmem>>, vector<1x128x64xbf16>
    %187 = vector.shape_cast %186 : vector<1x128x64xbf16> to vector<128x64xbf16>
    %cst_167 = arith.constant dense<0.000000e+00> : vector<1x64xf32>
    %188 = tpu.matmul %185, %187, %cst_167 {dimension_numbers = #tpu.dot_dimension_numbers<[1], [0], [0], [1], [0, 0, 1, 1], [], []>} : vector<1x128xbf16>, vector<128x64xbf16>, vector<1x64xf32> -> vector<1x64xf32>
    %189 = arith.addf %183, %188 : vector<1x64xf32>
    %cst_168 = arith.constant 0.000000e+00 : f32
    %190 = vector.broadcast %cst_168 : f32 to vector<1x64xf32>
    %191 = arith.maximumf %189, %190 : vector<1x64xf32>
    %192 = arith.truncf %191 : vector<1x64xf32> to vector<1x64xbf16>
    %c0_169 = arith.constant 0 : index
    %c0_170 = arith.constant 0 : index
    %193 = vector.load %arg8[%c0_169, %c0_170] : memref<64x128xbf16, #tpu.memory_space<vmem>>, vector<64x128xbf16>
    %cst_171 = arith.constant dense<0.000000e+00> : vector<1x128xf32>
    %194 = tpu.matmul %192, %193, %cst_171 {dimension_numbers = #tpu.dot_dimension_numbers<[1], [0], [0], [1], [0, 0, 1, 1], [], []>} : vector<1x64xbf16>, vector<64x128xbf16>, vector<1x128xf32> -> vector<1x128xf32>
    %c0_172 = arith.constant 0 : index
    %c0_173 = arith.constant 0 : index
    %195 = vector.load %arg9[%c0_172, %c0_173] : memref<1x128xf32, #tpu.memory_space<vmem>>, vector<1x128xf32>
    %196 = arith.addf %194, %195 : vector<1x128xf32>
    %cst_174 = arith.constant dense<0xFF800000> : vector<1xf32>
    %197 = vector.multi_reduction <maximumf>, %196, %cst_174 [1] : vector<1x128xf32> to vector<1xf32>
    %198 = vector.shape_cast %197 : vector<1xf32> to vector<1x1xf32>
    %199 = vector.broadcast %198 : vector<1x1xf32> to vector<1x128xf32>
    %200 = arith.subf %196, %199 : vector<1x128xf32>
    %201 = math.exp %200 : vector<1x128xf32>
    %cst_175 = arith.constant dense<0.000000e+00> : vector<1xf32>
    %202 = vector.multi_reduction <add>, %201, %cst_175 [1] : vector<1x128xf32> to vector<1xf32>
    %203 = vector.shape_cast %202 : vector<1xf32> to vector<1x1xf32>
    %204 = math.log %203 : vector<1x1xf32>
    %205 = vector.broadcast %204 : vector<1x1xf32> to vector<1x128xf32>
    %206 = arith.subf %200, %205 : vector<1x128xf32>
    %c0_176 = arith.constant 0 : index
    %c0_177 = arith.constant 0 : index
    %c0_178 = arith.constant 0 : index
    %207 = vector.load %arg10[%c0_176, %c0_177, %c0_178] : memref<1x1x128xf32, #tpu.memory_space<vmem>>, vector<1x1x128xf32>
    %208 = vector.shape_cast %207 : vector<1x1x128xf32> to vector<1x128xf32>
    %209 = vector.shape_cast %206 : vector<1x128xf32> to vector<1x1x128xf32>
    tpu.vector_store %arg10[%c0_176, %c0_177, %c0_178], %209 {strides = array<i32>} : memref<1x1x128xf32, #tpu.memory_space<vmem>>, vector<1x1x128xf32>,
    return
  }
  func.func @transform_0(%arg0: i32) -> (i32, i32, i32) {
    %c0_i32 = arith.constant 0 : i32
    %c0_i32_0 = arith.constant 0 : i32
    %c0_i32_1 = arith.constant 0 : i32
    return %arg0, %c0_i32, %c0_i32_0 : i32, i32, i32
  }
  func.func @transform_1(%arg0: i32) -> (i32, i32, i32, i32) {
    %c0_i32 = arith.constant 0 : i32
    %c0_i32_0 = arith.constant 0 : i32
    %c0_i32_1 = arith.constant 0 : i32
    %c0_i32_2 = arith.constant 0 : i32
    %c0_i32_3 = arith.constant 0 : i32
    return %c0_i32, %c0_i32_0, %c0_i32_1, %c0_i32_2 : i32, i32, i32, i32
  }
  func.func @transform_2(%arg0: i32) -> (i32, i32) {
    %c0_i32 = arith.constant 0 : i32
    %c0_i32_0 = arith.constant 0 : i32
    %c0_i32_1 = arith.constant 0 : i32
    return %c0_i32, %c0_i32_0 : i32, i32
  }
  func.func @transform_3(%arg0: i32) -> (i32, i32, i32, i32) {
    %c0_i32 = arith.constant 0 : i32
    %c0_i32_0 = arith.constant 0 : i32
    %c0_i32_1 = arith.constant 0 : i32
    %c0_i32_2 = arith.constant 0 : i32
    %c0_i32_3 = arith.constant 0 : i32
    return %c0_i32, %c0_i32_0, %c0_i32_1, %c0_i32_2 : i32, i32, i32, i32
  }
  func.func @transform_4(%arg0: i32) -> (i32, i32) {
    %c0_i32 = arith.constant 0 : i32
    %c0_i32_0 = arith.constant 0 : i32
    %c0_i32_1 = arith.constant 0 : i32
    return %c0_i32, %c0_i32_0 : i32, i32
  }
  func.func @transform_5(%arg0: i32) -> (i32, i32, i32) {
    %c0_i32 = arith.constant 0 : i32
    %c0_i32_0 = arith.constant 0 : i32
    %c0_i32_1 = arith.constant 0 : i32
    %c0_i32_2 = arith.constant 0 : i32
    return %c0_i32, %c0_i32_0, %c0_i32_1 : i32, i32, i32
  }
  func.func @transform_6(%arg0: i32) -> (i32, i32) {
    %c0_i32 = arith.constant 0 : i32
    %c0_i32_0 = arith.constant 0 : i32
    %c0_i32_1 = arith.constant 0 : i32
    return %c0_i32, %c0_i32_0 : i32, i32
  }
  func.func @transform_7(%arg0: i32) -> (i32, i32) {
    %c0_i32 = arith.constant 0 : i32
    %c0_i32_0 = arith.constant 0 : i32
    %c0_i32_1 = arith.constant 0 : i32
    return %c0_i32, %c0_i32_0 : i32, i32
  }
  func.func @transform_8(%arg0: i32) -> (i32, i32) {
    %c0_i32 = arith.constant 0 : i32
    %c0_i32_0 = arith.constant 0 : i32
    %c0_i32_1 = arith.constant 0 : i32
    return %c0_i32, %c0_i32_0 : i32, i32
  }
  func.func @transform_9(%arg0: i32) -> (i32, i32, i32) {
    %c0_i32 = arith.constant 0 : i32
    %c0_i32_0 = arith.constant 0 : i32
    %c0_i32_1 = arith.constant 0 : i32
    return %arg0, %c0_i32, %c0_i32_0 : i32, i32, i32
  }
}

</mosaic_0001>

<bundles_post_ra>
// kernel: cnn_forward.1
= control target key start
LH: loop header
LB: loop body
LE: loop exit
PB: predicated region body
PF: predicated region fallthrough
CT: control target
= control target key end

     0   :  { %14 = vsyncpa [#allocation5], 0  ;;  %s5795_s0 = inlined_call_operand.vmem [shape: f32[2,28,28], index: 0, kind: input, shape index: {}]   ;;  %s5796_s1 = inlined_call_operand.vmem [shape: bf16[2,5,28,192], index: 1, kind: input, shape index: {}]   ;;  %s5797_s2 = inlined_call_operand.vmem [shape: f32[1,192], index: 2, kind: input, shape index: {}]   ;;  %s5798_s3 = inlined_call_operand.vmem [shape: bf16[2,5,192,128], index: 3, kind: input, shape index: {}]   ;;  %s5799_s4 = inlined_call_operand.vmem [shape: f32[1,128], index: 4, kind: input, shape index: {}]   ;;  %s5800_s5 = inlined_call_operand.vmem [shape: bf16[4,128,64], index: 5, kind: input, shape index: {}]   ;;  %s5801_s6 = inlined_call_operand.vmem [shape: f32[1,64], index: 6, kind: input, shape index: {}]   ;;  %s5802_s7 = inlined_call_operand.vmem [shape: bf16[64,128], index: 7, kind: input, shape index: {}]   ;;  %s5803_s8 = inlined_call_operand.vmem [shape: f32[1,128], index: 8, kind: input, shape index: {}]   ;;  %s5804_s9 = inlined_call_operand.hbm [shape: f32[2,1,128], index: 9, kind: output, shape index: {}]  }
   0x1   :  { %16 = vsyncpa [#allocation5 + $0x1], 0  ;;  %s4743_s30 = smov 0   ;;  %s4745_s10 = smov 0  }
   0x2   :  { %s4747_s11 = smov 0   ;;  %s4749_s12 = smov 0  }
   0x3 LB: > { %s4764_s13 = sadd.s32 4294967295, %s4687_s12   ;;  %s3656_s14 = sadd.s32 4294967294, %s4687_s12   ;;  %s4687_s12 = sphi %s4749_s12, %s5818_s12   ;;  %s4683_s11 = sphi %s4747_s11, %s5817_s11   ;;  %s4679_s10 = sphi %s4745_s10, %s5816_s10   ;;  %s4675_s30 = sphi %s4743_s30, %s5815_s30  }
   0x4   : > { %s4768_s15 = sadd.s32 1, %s4687_s12   ;;  %s223_s16 = sadd.s32 1, %s4683_s11 }
   0x5   : > { %s220_s17 = ssub.s32 %s4687_s12, %s4768_s15  ;;  %p233_p0 = scmp.ne.s32.totalorder %s4683_s11, %s4679_s10 }
   0x6   : > { %p221_p1 = scmp.eq.s32.totalorder %s220_s17, 0  ;;  %p234_p2 = scmp.eq.s32.totalorder %s4764_s13, 1 }
   0x7   : > { %p239_p3 = scmp.ne.s32.totalorder %s4679_s10, %s4675_s30  ;;  %p240_p4 = scmp.eq.s32.totalorder %s3656_s14, 1 }
   0x8   : > { %s4779_s18 = scalar_select %p221_p1, %s4683_s11, %s223_s16  }
   0x9   : > { %p4781_p5 = por %p234_p2, %p233_p0  ;;  %p4785_p6 = por %p240_p4, %p239_p3 }
   0xa   : > { %p3659_p7 = scmp.ge.s32.totalorder %s4687_s12, 1  ;;  %p290_p8 = scmp.lt.s32.totalorder %s4687_s12, 3 }
   0xc   : > { %p291_p9 = pnand %p3659_p7, %p290_p8 }
   0xe   : > { %294 = sbr.rel (%p291_p9) target bundleno = 1891 (0x763), region = 56 }
  0x13   : > { %v4407_v0 = vld [vmem:[%s5796_s1 + $0x34] ss:$8 sps:$4 sm:$0x3f]   ;;  %vm380_vm0 = vcmask 1045504   ;;  %v4410_v2 = vld [vmem:[%s5796_s1 + $0x24] ss:$8 sps:$4 sm:$0xff]  }
  0x14   : > { %v4409_v1 = vld [vmem:[%s5796_s1 + $0x30] ss:$8 sps:$4 sm:$0x3f]   ;;  %3674 = vmatprep.subr.msk.bf16.mxu0 %vm380_vm0, %v4407_v0  ;;  %4361 = vmatprep.subr.msk.bf16.mxu1 %vm380_vm0, %v4407_v0  ;;  %v4412_v3 = vld [vmem:[%s5796_s1 + $0x20] ss:$8 sps:$4 sm:$0xff]   ;;  %p325_p10 = scmp.lt.s32.totalorder %s4764_s13, 1 }
  0x15   : > { %v382_v4 = vsel %vm380_vm0, %v4409_v1, 0  ;;  %v5805_v5 = vmov 0   ;;  %v4413_v6 = vld [vmem:[%s5796_s1 + $0x14] ss:$8 sps:$4 sm:$0x3f]   ;;  %vm373_vm1 = vcmask 228352  }
  0x16   : > { %419 = vmatprep.mubr.bf16.mxu0 %v5805_v5  ;;  %429 = vmatprep.mubr.bf16.mxu1 %v5805_v5  ;;  %s326_s29 = scalar_select %p325_p10, %s4764_s13, 1  ;;  %v4415_v7 = vld [vmem:[%s5796_s1 + $0xd4] ss:$8 sps:$4 sm:$0x3f]   ;;  %v4421_v17 = vld [vmem:[%s5796_s1 + $0x4] ss:$8 sps:$4 sm:$0xff]  }
  0x17   : > { %400 = vmatpush1.bf16.msra.mxu0 %v382_v4  ;;  %4363 = vmatpush1.bf16.msra.mxu1 %v382_v4  ;;  %v4417_v8 = vld [vmem:[%s5796_s1 + $0x10] ss:$8 sps:$4 sm:$0x3f]   ;;  %v4424_v18 = vld [vmem:[%s5796_s1 + $0xc4] ss:$8 sps:$4 sm:$0xff]   ;;  %vm1250_vm4 = vcmask 195584  }
  0x18   : > { %401 = vmatprep.subr.bf16.mxu0 %v4410_v2  ;;  %4362 = vmatprep.subr.bf16.mxu1 %v4410_v2  ;;  %s4213_s24 = sshll.u32 %s326_s29, 5  ;;  %v4418_v9 = vld [vmem:[%s5796_s1 + $0xd0] ss:$8 sps:$4 sm:$0x3f]   ;;  %v463_v13 = vsel %vm380_vm0, %v4417_v8, 0  ;;  %vm1442_vm7 = vcmask 523264  }
  0x19   : > { %s4825_s14 = scalar_lea.vmem %s5795_s0, %s4213_s24  ;;  %v543_v16 = vsel %vm380_vm0, %v4418_v9, 0  ;;  %v4419_v19 = vld [vmem:[%s5796_s1] ss:$8 sps:$4 sm:$0xff]   ;;  %v4425_v23 = vld [vmem:[%s5796_s1 + $0xb4] ss:$8 sps:$4 sm:$0x3f]  }
  0x1a   : > { %v345_v10 = vld [vmem:[%s4825_s14 + $0x1] sm:$0xff]  ;;  %v346_v11 = vld [vmem:[%s4825_s14 + $0x9] sm:$0xff]  ;;  %v347_v12 = vld [vmem:[%s4825_s14 + $0x11] sm:$0xff]  ;;  %vm1445_vm8 = vcmask 519168   ;;  %vm4691_vm9 = vmmov 0   ;;  %vm2908_vm10 = vcmask 64512  }
  0x1b   : > { %402 = vmatpush1.bf16.msra.mxu0 %v4412_v3  ;;  %4364 = vmatpush1.bf16.msra.mxu1 %v4412_v3  ;;  %v348_v14 = vpack.c.bf16 %v346_v11, %v345_v10  ;;  %v349_v15 = vpack.c.bf16 %v347_v12, %v347_v12  ;;  %v4422_v20 = vld [vmem:[%s5796_s1 + $0xc0] ss:$8 sps:$4 sm:$0xff]   ;;  %v4427_v24 = vld [vmem:[%s5796_s1 + $0x54] ss:$8 sps:$4 sm:$0x3f]   ;;  %vm3574_vm11 = vcmask 1040384  }
  0x1c   : > { %3681 = vmatprep.subr.msk.bf16.mxu1 %vm380_vm0, %v4413_v6  ;;  %3692 = vmatprep.subr.msk.bf16.mxu0 %vm380_vm0, %v4415_v7  ;;  %v331_v21 = vld [vmem:[%s4825_s14] sm:$0xff]  ;;  %v332_v22 = vld [vmem:[%s4825_s14 + $0x8] sm:$0xff]  ;;  %v4429_v25 = vld [vmem:[%s5796_s1 + $0xb0] ss:$8 sps:$4 sm:$0x3f]   ;;  %s323_s23 = sand.u32 1, %s4679_s10  }
  0x1d   : > { %v4430_v26 = vld [vmem:[%s5796_s1 + $0x50] ss:$8 sps:$4 sm:$0x3f]   ;;  %v334_v27 = vpack.c.bf16 %v332_v22, %v331_v21  ;;  %v618_v28 = vsel %vm380_vm0, %v4429_v25, 0  ;;  %v4433_v29 = vld [vmem:[%s5796_s1 + $0xa4] ss:$8 sps:$4 sm:$0xff]  }
  0x1e   : > { %3675 = vmatmul.mubr.msk.bf16.vlgmr.msra.gmra.mxu0 %vm373_vm1, %v348_v14  ;;  %3676 = vmatmul.mubr.msk.bf16.vlgmr.msra.gmra.mxu1 %vm373_vm1, %v349_v15  ;;  %v709_v30 = vsel %vm380_vm0, %v4430_v26, 0  ;;  %v4436_v31 = vld [vmem:[%s5796_s1 + $0x44] ss:$8 sps:$4 sm:$0xff]   ;;  %v333_v32 = vld [vmem:[%s4825_s14 + $0x10] sm:$0xff]  ;;  %v4431_v33 = vld [vmem:[%s5796_s1 + $0xa0] ss:$8 sps:$4 sm:$0xff]  }
  0x1f   : > { %481 = vmatpush1.bf16.msra.mxu1 %v463_v13  ;;  %561 = vmatpush1.bf16.msra.mxu0 %v543_v16  ;;  %v4434_v34 = vld [vmem:[%s5796_s1 + $0x40] ss:$8 sps:$4 sm:$0xff]   ;;  %v4437_v35 = vld [vmem:[%s5796_s1 + $0xf4] ss:$8 sps:$4 sm:$0x3f]   ;;  %v335_v37 = vpack.c.bf16 %v333_v32, %v333_v32  ;;  %v1041_v7 = vld [vmem:[%s4825_s14 + $0xc] sm:$0xff] }
  0x20   : > { %482 = vmatprep.subr.bf16.mxu1 %v4421_v17  ;;  %562 = vmatprep.subr.bf16.mxu0 %v4424_v18  ;;  %v4439_v36 = vld [vmem:[%s5796_s1 + $0x74] ss:$8 sps:$4 sm:$0x3f]   ;;  %v674_v38 = vld [vmem:[%s4825_s14 + $0x2] sm:$0xff]  ;;  %v675_v40 = vld [vmem:[%s4825_s14 + $0xa] sm:$0xff]  ;;  %v5807_v13 = vmov 0.0  }
  0x21   : > { %500 = vmatprep.mubr.bf16.mxu1 %v5805_v5  ;;  %580 = vmatprep.mubr.bf16.mxu0 %v5805_v5  ;;  %v4441_v39 = vld [vmem:[%s5796_s1 + $0xf0] ss:$8 sps:$4 sm:$0x3f]   ;;  %v677_v44 = vpack.c.bf16 %v675_v40, %v674_v38  ;;  %v4445_v46 = vld [vmem:[%s5796_s1 + $0xe4] ss:$8 sps:$4 sm:$0xff]   ;;  %s4210_s24 = sshll.u32 %s4764_s13, 4 }
  0x22   : > { %v4442_v41 = vld [vmem:[%s5796_s1 + $0x70] ss:$8 sps:$4 sm:$0x3f]   ;;  %v795_v45 = vsel %vm380_vm0, %v4441_v39, 0  ;;  %v4448_v49 = vld [vmem:[%s5796_s1 + $0x64] ss:$8 sps:$4 sm:$0xff]   ;;  %s3599_s28 = scalar_lea.hbm %s5804_s9, %s4210_s24 }
  0x23   : > { %483 = vmatpush1.bf16.msra.mxu1 %v4419_v19  ;;  %563 = vmatpush1.bf16.msra.mxu0 %v4422_v20  ;;  %v4453_v42 = vld [vmem:[%s5796_s1 + $0x110] ss:$8 sps:$4 sm:$0x3f]   ;;  %v892_v48 = vsel %vm380_vm0, %v4442_v41, 0  ;;  %v4443_v54 = vld [vmem:[%s5796_s1 + $0xe0] ss:$8 sps:$4 sm:$0xff]  }
  0x24   : > { %3699 = vmatprep.subr.msk.bf16.mxu1 %vm380_vm0, %v4425_v23  ;;  %3710 = vmatprep.subr.msk.bf16.mxu0 %vm380_vm0, %v4427_v24  ;;  %v4454_v43 = vld [vmem:[%s5796_s1 + $0x90] ss:$8 sps:$4 sm:$0x3f]   ;;  %v978_v50 = vsel %vm380_vm0, %v4453_v42, 0  ;;  %v4446_v55 = vld [vmem:[%s5796_s1 + $0x60] ss:$8 sps:$4 sm:$0xff]  }
  0x25   : > { %v4463_v47 = vld [vmem:[%s5796_s1 + $0x130] ss:$8 sps:$4 sm:$0x3f]   ;;  %v1075_v52 = vsel %vm380_vm0, %v4454_v43, 0  ;;  %v857_v59 = vld [vmem:[%s4825_s14 + $0x3] sm:$0xff]  ;;  %s324_s25 = scalar_lea.vmem [#allocation4], %s323_s23 }
  0x26   : > { %3682 = vmatmul.mubr.msk.bf16.vlgmr.msra.gmra.mxu1 %vm373_vm1, %v334_v27  ;;  %3693 = vmatmul.mubr.msk.bf16.vlgmr.msra.gmra.mxu0 %vm373_vm1, %v348_v14  ;;  %v676_v51 = vld [vmem:[%s4825_s14 + $0x12] sm:$0xff]  ;;  %v1161_v53 = vsel %vm380_vm0, %v4463_v47, 0  ;;  %v4457_v62 = vld [vmem:[%s5796_s1 + $0x104] ss:$8 sps:$4 sm:$0xff]   ;;  %v4455_v1 = vld [vmem:[%s5796_s1 + $0x100] ss:$8 sps:$4 sm:$0xff]  }
  0x27   : > { %510 = vmatprep.mubr.bf16.mxu1 %v5805_v5  ;;  %590 = vmatprep.mubr.bf16.mxu0 %v5805_v5  ;;  %v4449_v56 = vld [vmem:[%s5796_s1 + $0x114] ss:$8 sps:$4 sm:$0x3f]   ;;  %v678_v58 = vpack.c.bf16 %v676_v51, %v676_v51  ;;  %v858_v60 = vld [vmem:[%s4825_s14 + $0xb] sm:$0xff]  ;;  %s3601_s26 = sshll.u32 %s324_s25, 4  ;;  %s3589_s29 = scalar_lea.sflag [#allocation5], %s323_s23  ;;  %s3602_s26 = int_to_ptr.vmem [resolvable:$true] %s3601_s26 }
  0x28   : > { %636 = vmatpush1.bf16.msra.mxu1 %v618_v28  ;;  %727 = vmatpush1.bf16.msra.mxu0 %v709_v30  ;;  %v4451_v57 = vld [vmem:[%s5796_s1 + $0x94] ss:$8 sps:$4 sm:$0x3f]   ;;  %v860_v61 = vpack.c.bf16 %v858_v60, %v857_v59  ;;  %v4460_v63 = vld [vmem:[%s5796_s1 + $0x84] ss:$8 sps:$4 sm:$0xff]   ;;  %s4627_s16 = scalar_lea.vmem %s3602_s26, 16 }
  0x29   : > { %637 = vmatprep.subr.bf16.mxu1 %v4433_v29  ;;  %728 = vmatprep.subr.bf16.mxu0 %v4436_v31  ;;  %v859_v0 = vld [vmem:[%s4825_s14 + $0x13] sm:$0xff]  ;;  %v4458_v2 = vld [vmem:[%s5796_s1 + $0x80] ss:$8 sps:$4 sm:$0xff]   ;;  %v4466_v9 = vld [vmem:[%s5796_s1 + $0x124] ss:$8 sps:$4 sm:$0xff]   ;;  %p4628_p11 = scmp.ne.s32.totalorder %s3602_s26, %s4627_s16  ;;  %s4692_s17 = smov [#allocation4]  }
  0x2a   : > { %v4461_v3 = vld [vmem:[%s5796_s1 + $0x134] ss:$8 sps:$4 sm:$0x3f]   ;;  %v861_v4 = vpack.c.bf16 %v859_v0, %v859_v0  ;;  %v1040_v6 = vld [vmem:[%s4825_s14 + $0x4] sm:$0xff]  ;;  %s4631_s21 = sshll.u32 %s4692_s17, 4  ;;  %s4632_s21 = int_to_ptr.vmem [resolvable:$false] %s4631_s21 }
  0x2b   : > { %v1043_v8 = vpack.c.bf16 %v1041_v7, %v1040_v6  ;;  %v1042_v10 = vld [vmem:[%s4825_s14 + $0x14] sm:$0xff]  ;;  %v4464_v11 = vld [vmem:[%s5796_s1 + $0x120] ss:$8 sps:$4 sm:$0xff]   ;;  %p4629_p12 = pnand %p4628_p11, %p4781_p5  ;;  %s4633_s13 = scalar_lea.vmem %s4632_s21, 32 }
  0x2c   : > { %638 = vmatpush1.bf16.msra.mxu1 %v4431_v33  ;;  %729 = vmatpush1.bf16.msra.mxu0 %v4434_v34  ;;  %v1044_v12 = vpack.c.bf16 %v1042_v10, %v1042_v10  ;;  %p4634_p0 = scmp.lt.s32.totalorder %s3602_s26, %s4632_s21  ;;  %p4635_p1 = scmp.lt.s32.totalorder %s4633_s13, %s4627_s16 }
  0x2d   : > { %3721 = vmatprep.subr.msk.bf16.mxu1 %vm380_vm0, %v4437_v35  ;;  %3732 = vmatprep.subr.msk.bf16.mxu0 %vm380_vm0, %v4439_v36  ;;  %p4630_p13 = pneg %p4629_p12 }
  0x2e   : > { %3683 = vmatmul.mubr.msk.bf16.gmra.mxu1 %vm373_vm1, %v335_v37  ;;  %3694 = vmatmul.mubr.msk.bf16.gmra.mxu0 %vm373_vm1, %v349_v15  ;;  %p4636_p2 = por %p4635_p1, %p4634_p0 }
  0x2f   : > { %655 = vmatprep.mubr.bf16.mxu1 %v5805_v5  ;;  %746 = vmatprep.mubr.bf16.mxu0 %v5805_v5 }
  0x30   : > { %p4637_p3 = pnand %p4636_p2, %p4630_p13 }
  0x36   : > { %3700 = vmatmul.mubr.msk.bf16.vlgmr.msra.gmra.mxu1 %vm373_vm1, %v334_v27  ;;  %3711 = vmatmul.mubr.msk.bf16.vlgmr.msra.gmra.mxu0 %vm373_vm1, %v677_v44 }
  0x37   : > { %665 = vmatprep.mubr.bf16.mxu1 %v5805_v5  ;;  %756 = vmatprep.mubr.bf16.mxu0 %v5805_v5 }
  0x38   : > { %813 = vmatpush1.bf16.msra.mxu1 %v795_v45  ;;  %910 = vmatpush1.bf16.msra.mxu0 %v892_v48 }
  0x39   : > { %814 = vmatprep.subr.bf16.mxu1 %v4445_v46  ;;  %911 = vmatprep.subr.bf16.mxu0 %v4448_v49 }
  0x3c   : > { %815 = vmatpush1.bf16.msra.mxu1 %v4443_v54  ;;  %912 = vmatpush1.bf16.msra.mxu0 %v4446_v55 }
  0x3d   : > { %3743 = vmatprep.subr.msk.bf16.mxu1 %vm380_vm0, %v4449_v56  ;;  %3754 = vmatprep.subr.msk.bf16.mxu0 %vm380_vm0, %v4451_v57 }
  0x3e   : > { %3701 = vmatmul.mubr.msk.bf16.gmra.mxu1 %vm373_vm1, %v335_v37  ;;  %3712 = vmatmul.mubr.msk.bf16.gmra.mxu0 %vm373_vm1, %v678_v58 }
  0x3f   : > { %832 = vmatprep.mubr.bf16.mxu1 %v5805_v5  ;;  %929 = vmatprep.mubr.bf16.mxu0 %v5805_v5 }
  0x46   : > { %3722 = vmatmul.mubr.msk.bf16.vlgmr.msra.gmra.mxu1 %vm373_vm1, %v677_v44  ;;  %3733 = vmatmul.mubr.msk.bf16.vlgmr.msra.gmra.mxu0 %vm373_vm1, %v860_v61 }
  0x47   : > { %842 = vmatprep.mubr.bf16.mxu1 %v5805_v5  ;;  %939 = vmatprep.mubr.bf16.mxu0 %v5805_v5 }
  0x48   : > { %996 = vmatpush1.bf16.msra.mxu1 %v978_v50  ;;  %1093 = vmatpush1.bf16.msra.mxu0 %v1075_v52 }
  0x49   : > { %997 = vmatprep.subr.bf16.mxu1 %v4457_v62  ;;  %1094 = vmatprep.subr.bf16.mxu0 %v4460_v63 }
  0x4c   : > { %998 = vmatpush1.bf16.msra.mxu1 %v4455_v1  ;;  %1095 = vmatpush1.bf16.msra.mxu0 %v4458_v2 }
  0x4d   : > { %3765 = vmatprep.subr.msk.bf16.mxu1 %vm380_vm0, %v4461_v3 }
  0x4e   : > { %3723 = vmatmul.mubr.msk.bf16.gmra.mxu1 %vm373_vm1, %v678_v58  ;;  %3734 = vmatmul.mubr.msk.bf16.gmra.mxu0 %vm373_vm1, %v861_v4 }
  0x4f   : > { %1015 = vmatprep.mubr.bf16.mxu1 %v5805_v5  ;;  %1112 = vmatprep.mubr.bf16.mxu0 %v5805_v5 }
  0x56   : > { %3744 = vmatmul.mubr.msk.bf16.vlgmr.msra.gmra.mxu1 %vm373_vm1, %v860_v61  ;;  %3755 = vmatmul.mubr.msk.bf16.vlgmr.msra.gmra.mxu0 %vm373_vm1, %v1043_v8 }
  0x57   : > { %1025 = vmatprep.mubr.bf16.mxu1 %v5805_v5  ;;  %1122 = vmatprep.mubr.bf16.mxu0 %v5805_v5 }
  0x58   : > { %1179 = vmatpush1.bf16.msra.mxu1 %v1161_v53 }
  0x59   : > { %1180 = vmatprep.subr.bf16.mxu1 %v4466_v9 }
  0x5c   : > { %1181 = vmatpush1.bf16.msra.mxu1 %v4464_v11 }
  0x5e   : > { %3745 = vmatmul.mubr.msk.bf16.gmra.mxu1 %vm373_vm1, %v861_v4  ;;  %3756 = vmatmul.mubr.msk.bf16.gmra.mxu0 %vm373_vm1, %v1044_v12 }
  0x5f   : > { %1198 = vmatprep.mubr.bf16.mxu1 %v5805_v5  ;;  %1321 = vmatprep.mubr.f32.mxu0 %v5807_v13 }
  0x66   : > { %3766 = vmatmul.mubr.msk.bf16.vlgmr.msra.gmra.mxu1 %vm373_vm1, %v1043_v8 }
  0x67   : > { %1208 = vmatprep.mubr.bf16.mxu1 %v5805_v5 }
  0x6e   : > { %3767 = vmatmul.mubr.msk.bf16.gmra.mxu1 %vm373_vm1, %v1044_v12 }
  0x6f   : > { %1404 = vmatprep.mubr.f32.mxu1 %v5807_v13 }
  0xde   : > { %v421_v14 = vpop.f32.mrf.mxu0  ;;  %v4996_v15 = vpop.f32.mrf.mxu1 }
  0xe0   : > { %v423_v16 = vpop.f32.mrf.mxu0  ;;  %v4998_v17 = vpop.f32.mrf.mxu1 }
  0xe2   : > { %v425_v18 = vpop.f32.mrf.mxu0  ;;  %v435_v19 = vpop.f32.mrf.mxu1 }
  0xe4   : > { %v427_v20 = vpop.f32.mrf.mxu0  ;;  %v436_v21 = vpop.f32.mrf.mxu1 }
  0xe6   : > { %v502_v22 = vpop.f32.mrf.mxu1  ;;  %v5000_v23 = vpop.f32.mrf.mxu0 }
  0xe7   : > { %v5002_v24 = vadd.f32 %v502_v22, %v421_v14 }
  0xe8   : > { %v504_v25 = vpop.f32.mrf.mxu1  ;;  %v5004_v26 = vpop.f32.mrf.mxu0 }
  0xe9   : > { %v5006_v27 = vadd.f32 %v504_v25, %v423_v16 }
  0xea   : > { %v506_v28 = vpop.f32.mrf.mxu1  ;;  %v5008_v29 = vpop.f32.mrf.mxu0 }
  0xeb   : > { %v5010_v30 = vadd.f32 %v506_v28, %v425_v18 }
  0xec   : > { %v508_v31 = vpop.f32.mrf.mxu1  ;;  %v5012_v32 = vpop.f32.mrf.mxu0 }
  0xed   : > { %v5014_v33 = vadd.f32 %v508_v31, %v427_v20 }
  0xee   : > { %v5016_v34 = vpop.f32.mrf.mxu1  ;;  %v5018_v35 = vpop.f32.mrf.mxu0 }
  0xf0   : > { %v5020_v36 = vpop.f32.mrf.mxu1  ;;  %v5022_v37 = vpop.f32.mrf.mxu0 }
  0xf2   : > { %v516_v38 = vpop.f32.mrf.mxu1  ;;  %v596_v39 = vpop.f32.mrf.mxu0 }
  0xf3   : > { %v1229_v38 = vlaneseq }
  0xf4   : > { %v517_v40 = vpop.f32.mrf.mxu1  ;;  %v597_v41 = vpop.f32.mrf.mxu0 }
  0xf6   : > { %v657_v42 = vpop.f32.mrf.mxu1  ;;  %v748_v43 = vpop.f32.mrf.mxu0 }
  0xf7   : > { %v658_v39 = vadd.f32 %v657_v42, %v5000_v23 }
  0xf8   : > { %v659_v44 = vpop.f32.mrf.mxu1  ;;  %v750_v45 = vpop.f32.mrf.mxu0 }
  0xfa   : > { %v661_v46 = vpop.f32.mrf.mxu1  ;;  %v752_v47 = vpop.f32.mrf.mxu0 }
  0xfb   : > { %v767_v23 = vadd.f32 %v752_v47, %v5010_v30  ;;  %v515_v30 = vadd.f32 %v5020_v36, %v4998_v17 }
  0xfc   : > { %v663_v48 = vpop.f32.mrf.mxu1  ;;  %v754_v49 = vpop.f32.mrf.mxu0 }
  0xfd   : > { %v664_v42 = vadd.f32 %v663_v48, %v5012_v32 }
  0xfe   : > { %v5024_v50 = vpop.f32.mrf.mxu1  ;;  %v5026_v51 = vpop.f32.mrf.mxu0 }
  0xff   : > { %v668_v32 = vadd.f32 %v5024_v50, %v5018_v35 }
 0x100   : > { %v5028_v52 = vpop.f32.mrf.mxu1  ;;  %v5030_v53 = vpop.f32.mrf.mxu0 }
 0x102   : > { %v671_v54 = vpop.f32.mrf.mxu1  ;;  %v762_v55 = vpop.f32.mrf.mxu0 }
 0x103   : > { %v765_v54 = vadd.f32 %v748_v43, %v5002_v24  ;;  %v660_v55 = vadd.f32 %v659_v44, %v5004_v26 }
 0x104   : > { %v672_v56 = vpop.f32.mrf.mxu1  ;;  %v763_v57 = vpop.f32.mrf.mxu0 }
 0x105   : > { %v766_v57 = vadd.f32 %v750_v45, %v5006_v27  ;;  %v768_v27 = vadd.f32 %v754_v49, %v5014_v33 }
 0x106   : > { %v834_v58 = vpop.f32.mrf.mxu1  ;;  %v931_v59 = vpop.f32.mrf.mxu0 }
 0x107   : > { %v851_v56 = vadd.f32 %v834_v58, %v658_v39  ;;  %v948_v5 = vadd.f32 %v931_v59, %v765_v54 }
 0x108   : > { %v836_v60 = vpop.f32.mrf.mxu1  ;;  %v933_v61 = vpop.f32.mrf.mxu0 }
 0x109   : > { %v852_v13 = vadd.f32 %v836_v60, %v660_v55 }
 0x10a   : > { %v838_v62 = vpop.f32.mrf.mxu1  ;;  %v935_v63 = vpop.f32.mrf.mxu0 }
 0x10b   : > { %v950_v45 = vadd.f32 %v935_v63, %v767_v23  ;;  %v770_v63 = vadd.f32 %v5030_v53, %v515_v30  ;;  %v5814_v23 = vmov 0   ;;  %v4485_v30 = vld [vmem:[%s5798_s3 + $0x48] sm:$0xff]  }
 0x10c   : > { %v840_v0 = vpop.f32.mrf.mxu1  ;;  %v937_v1 = vpop.f32.mrf.mxu0 }
 0x10d   : > { %v854_v39 = vadd.f32 %v840_v0, %v664_v42  ;;  %v4468_v42 = vld [vmem:[%s5798_s3 + $0x30] sm:$0xff]  }
 0x10e   : > { %v5032_v2 = vpop.f32.mrf.mxu1  ;;  %v5034_v3 = vpop.f32.mrf.mxu0 }
 0x10f   : > { %v855_v0 = vadd.f32 %v5032_v2, %v668_v32  ;;  %v4486_v32 = vld [vmem:[%s5798_s3 + $0xb8] sm:$0xff]  }
 0x110   : > { %v5036_v4 = vpop.f32.mrf.mxu1  ;;  %v5038_v6 = vpop.f32.mrf.mxu0 }
 0x112   : > { %v848_v7 = vpop.f32.mrf.mxu1  ;;  %v945_v8 = vpop.f32.mrf.mxu0 }
 0x114   : > { %v849_v9 = vpop.f32.mrf.mxu1  ;;  %v946_v10 = vpop.f32.mrf.mxu0 }
 0x115   : > { %v5046_v9 = vshrl.u32 %v1229_v38, 7  ;;  %v662_v10 = vadd.f32 %v661_v46, %v5008_v29 }
 0x116   : > { %v1017_v11 = vpop.f32.mrf.mxu1  ;;  %v1114_v12 = vpop.f32.mrf.mxu0 }
 0x117   : > { %v853_v43 = vadd.f32 %v838_v62, %v662_v10  ;;  %v1131_v26 = vadd.f32 %v1114_v12, %v948_v5  ;;  %v1234_v29 = vmul.u32 2, %v5046_v9  ;;  %v670_v5 = vadd.f32 %v5028_v52, %v5022_v37 }
 0x118   : > { %v1019_v14 = vpop.f32.mrf.mxu1  ;;  %v1116_v16 = vpop.f32.mrf.mxu0  ;;  %v513_v62 = vadd.f32 %v5016_v34, %v4996_v15  ;;  %v1231_v36 = vadd.s32 8, %v5046_v9 }
 0x119   : > { %v1035_v44 = vadd.f32 %v1019_v14, %v852_v13  ;;  %v951_v13 = vadd.f32 %v937_v1, %v768_v27  ;;  %v856_v35 = vadd.f32 %v5036_v4, %v670_v5  ;;  %v1242_v54 = vadd.s32 1, %v1234_v29  ;;  %v4478_v27 = vld [vmem:[%s5798_s3 + $0x78] sm:$0xff]   ;;  %v4487_v5 = vld [vmem:[%s5798_s3 + $0x40] sm:$0xff]  }
 0x11a   : > { %v1021_v18 = vpop.f32.mrf.mxu1  ;;  %v1118_v19 = vpop.f32.mrf.mxu0  ;;  %v769_v1 = vadd.f32 %v5026_v51, %v513_v62  ;;  %v1235_v4 = vmul.u32 2, %v1231_v36 }
 0x11b   : > { %v1036_v59 = vadd.f32 %v1021_v18, %v853_v43  ;;  %v1133_v47 = vadd.f32 %v1118_v19, %v950_v45  ;;  %v1233_v19 = vand.u32 127, %v1229_v38  ;;  %v4467_v38 = vld [vmem:[%s5798_s3 + $0x38] sm:$0xff]   ;;  %v4474_v43 = vld [vmem:[%s5798_s3 + $0x88] sm:$0xff]   ;;  %v4475_v45 = vld [vmem:[%s5798_s3 + $0x10] sm:$0xff]  }
 0x11c   : > { %v1023_v20 = vpop.f32.mrf.mxu1  ;;  %v1120_v21 = vpop.f32.mrf.mxu0  ;;  %v952_v34 = vadd.f32 %v5034_v3, %v769_v1  ;;  %v5813_v3 = vmov 0.0  }
 0x11d   : > { %v1037_v48 = vadd.f32 %v1023_v20, %v854_v39  ;;  %v1134_v50 = vadd.f32 %v1120_v21, %v951_v13  ;;  %vm1236_vm2 = vcmp.eq.s32.totalorder %v1233_v19, %v1234_v29  ;;  %vm1244_vm3 = vcmp.eq.s32.totalorder %v1233_v19, %v1242_v54  ;;  %v4477_v39 = vld [vmem:[%s5798_s3 + $0x8] sm:$0xff]   ;;  %v4480_v29 = vld [vmem:[%s5798_s3 + $0x70] sm:$0xff]  }
 0x11e   : > { %v1027_v22 = vpop.f32.mrf.mxu1  ;;  %v5040_v25 = vpop.f32.mrf.mxu0  ;;  %vm1237_vm5 = vcmp.eq.s32.totalorder %v1233_v19, %v1235_v4  ;;  %v4488_v13 = vld [vmem:[%s5798_s3 + $0xb0] sm:$0xff]  }
 0x11f   : > { %5811 = vst [vmem:[#allocation7_spill] sm:$0xff] %v5040_v25  ;;  %v1034_v25 = vadd.f32 %v1017_v11, %v851_v56  ;;  %v1038_v12 = vadd.f32 %v1027_v22, %v855_v0 }
 0x120   : > { %v1029_v28 = vpop.f32.mrf.mxu1  ;;  %v1126_v31 = vpop.f32.mrf.mxu0 }
 0x121   : > { %v1039_v18 = vadd.f32 %v1029_v28, %v856_v35  ;;  %v5070_v28 = vsel %vm1236_vm2, 1.0, %v5813_v3 }
 0x122   : > { %v1031_v40 = vpop.f32.mrf.mxu1  ;;  %v1128_v41 = vpop.f32.mrf.mxu0 }
 0x123   : > { %v949_v40 = vadd.f32 %v933_v61, %v766_v57 }
 0x124   : > { %v1032_v7 = vpop.f32.mrf.mxu1  ;;  %v1129_v8 = vpop.f32.mrf.mxu0 }
 0x125   : > { %v1132_v46 = vadd.f32 %v1116_v16, %v949_v40  ;;  %v953_v16 = vadd.f32 %v5038_v6, %v770_v63  ;;  %v1243_v6 = vadd.s32 1, %v1235_v4  ;;  %v4470_v7 = vld [vmem:[%s5798_s3 + $0x98] sm:$0xff]   ;;  %v3769_v8 = vsel %vm1237_vm5, 1.0, %v5813_v3  ;;  %v4472_v40 = vld [vmem:[%s5798_s3 + $0x90] sm:$0xff]  }
 0x126   : > { %v1200_v24 = vpop.f32.mrf.mxu1  ;;  %v5812_v21 = vld [vmem:[#allocation7_spill] sm:$0xff] }
 0x127   : > { %v1217_v58 = vadd.f32 %v1200_v24, %v1034_v25  ;;  %v1136_v20 = vadd.f32 %v1126_v31, %v953_v16  ;;  %v1135_v55 = vadd.f32 %v5812_v21, %v952_v34  ;;  %v5073_v31 = vsel %vm1244_vm3, 1.0, %v5813_v3  ;;  %v4469_v24 = vld [vmem:[%s5798_s3 + $0x28] sm:$0xff]   ;;  %v4489_v21 = vld [vmem:[%s5798_s3 + $0x218] sm:$0xff]  }
 0x128   : > { %v1202_v41 = vpop.f32.mrf.mxu1  ;;  %vm1245_vm6 = vcmp.eq.s32.totalorder %v1233_v19, %v1243_v6 }
 0x129   : > { %v1223_v60 = vmax.f32 %v1131_v26, %v1217_v58  ;;  %v1218_v11 = vadd.f32 %v1202_v41, %v1035_v44  ;;  %v3771_v10 = vsel %vm1245_vm6, 1.0, %v5813_v3  ;;  %v4471_v26 = vld [vmem:[%s5798_s3 + $0x20] sm:$0xff]   ;;  %v4473_v58 = vld [vmem:[%s5798_s3 + $0x18] sm:$0xff]  }
 0x12a   : > { %v1204_v33 = vpop.f32.mrf.mxu1  ;;  %v4476_v44 = vld [vmem:[%s5798_s3 + $0x80] sm:$0xff]  }
 0x12b   : > { %v1224_v49 = vmax.f32 %v1132_v46, %v1218_v11  ;;  %v1219_v61 = vadd.f32 %v1204_v33, %v1036_v59  ;;  %v4479_v41 = vld [vmem:[%s5798_s3] sm:$0xff]   ;;  %v4481_v46 = vld [vmem:[%s5798_s3 + $0x58] sm:$0xff]   ;;  %v4482_v59 = vld [vmem:[%s5798_s3 + $0x68] sm:$0xff]  }
 0x12c   : > { %v1206_v17 = vpop.f32.mrf.mxu1  ;;  %v4484_v11 = vld [vmem:[%s5798_s3 + $0x60] sm:$0xff]   ;;  %v4490_v33 = vld [vmem:[%s5798_s3 + $0xa8] sm:$0xff]  }
 0x12d   : > { %v1225_v37 = vmax.f32 %v1133_v47, %v1219_v61  ;;  %v1220_v52 = vadd.f32 %v1206_v17, %v1037_v48  ;;  %v4492_v47 = vld [vmem:[%s5798_s3 + $0xa0] sm:$0xff]   ;;  %v1425_v48 = vsub.s32 0, %v5046_v9  ;;  %v1429_v61 = vsub.s32 1, %v5046_v9 }
 0x12e   : > { %v1210_v14 = vpop.f32.mrf.mxu1 }
 0x12f   : > { %v1226_v15 = vmax.f32 %v1134_v50, %v1220_v52  ;;  %v1221_v53 = vadd.f32 %v1210_v14, %v1038_v12 }
 0x130   : > { %v1212_v2 = vpop.f32.mrf.mxu1 }
 0x131   : > { %v1222_v25 = vadd.f32 %v1212_v2, %v1039_v18  ;;  %v1227_v51 = vmax.f32 %v1135_v55, %v1221_v53 }
 0x132   : > { %v1214_v56 = vpop.f32.mrf.mxu1 }
 0x133   : > { %v1228_v57 = vmax.f32 %v1136_v20, %v1222_v25 }
 0x134   : > { %v1215_v22 = vpop.f32.mrf.mxu1 }
 0x135   : > { %1283 = vmatprep.subr.mxu0 %v1228_v57  ;;  %1366 = vmatprep.subr.mxu1 %v1228_v57 }
 0x136   : > { %1284 = vmatpush1.msra.mxu0 %v1227_v51  ;;  %1367 = vmatpush1.msra.mxu1 %v1227_v51 }
 0x137   : > { %1285 = vmatprep.subr.mxu0 %v1226_v15  ;;  %1368 = vmatprep.subr.mxu1 %v1226_v15 }
 0x138   : > { %1286 = vmatpush1.msra.mxu0 %v1225_v37  ;;  %1369 = vmatpush1.msra.mxu1 %v1225_v37 }
 0x139   : > { %1287 = vmatprep.subr.mxu0 %v1224_v49  ;;  %1370 = vmatprep.subr.mxu1 %v1224_v49  ;;  %v1421_v49 = vld [vmem:[%s5797_s2] sm:$0x3] }
 0x13a   : > { %1288 = vmatpush1.msra.mxu0 %v1223_v60  ;;  %1371 = vmatpush1.msra.mxu1 %v1223_v60  ;;  %v4483_v60 = vld [vmem:[%s5798_s3 + $0x50] sm:$0xff]   ;;  %v1426_v62 = vrot.slane %v1421_v49, %v1425_v48  ;;  %v1430_v36 = vrot.slane %v1421_v49, %v1429_v61  ;;  %v4509_v48 = vld [vmem:[%s5798_s3 + $0x228] sm:$0xff]   ;;  %v4510_v49 = vld [vmem:[%s5798_s3 + $0x298] sm:$0xff]  }
 0x13b   : > { %3772 = vmatmul.mubr.msk.f32.vlgmr.msra.gmra.mxu0 %vm1250_vm4, %v5070_v28  ;;  %3774 = vmatmul.mubr.msk.f32.vlgmr.msra.gmra.mxu1 %vm1250_vm4, %v5073_v31 }
 0x13c   : > { %1327 = vmatprep.mubr.f32.mxu0 %v5813_v3  ;;  %1410 = vmatprep.mubr.f32.mxu1 %v5813_v3 }
 0x13d   : > { %1736 = vmatprep.subr.bf16.mxu1 %v5814_v23  ;;  %1621 = vmatprep.subr.bf16.mxu0 %v5814_v23 }
 0x13e   : > { %1737 = vmatpush1.bf16.msra.mxu1 %v4467_v38  ;;  %1622 = vmatpush1.bf16.msra.mxu0 %v4470_v7  ;;  %v4491_v38 = vld [vmem:[%s5798_s3 + $0x210] sm:$0xff]  }
 0x13f   : > { %3773 = vmatmul.mubr.msk.f32.gmra.mxu0 %vm1250_vm4, %v3769_v8  ;;  %3775 = vmatmul.mubr.msk.f32.gmra.mxu1 %vm1250_vm4, %v3771_v10 }
 0x140   : > { %1738 = vmatprep.subr.bf16.mxu1 %v5814_v23  ;;  %1623 = vmatprep.subr.bf16.mxu0 %v5814_v23 }
 0x142   : > { %1739 = vmatpush1.bf16.msra.mxu1 %v4468_v42  ;;  %1624 = vmatpush1.bf16.msra.mxu0 %v4472_v40  ;;  %v4493_v40 = vld [vmem:[%s5798_s3 + $0x208] sm:$0xff]  }
 0x143   : > { %1740 = vmatprep.subr.bf16.mxu1 %v5814_v23  ;;  %1625 = vmatprep.subr.bf16.mxu0 %v5814_v23 }
 0x146   : > { %1741 = vmatpush1.bf16.msra.mxu1 %v4469_v24  ;;  %1626 = vmatpush1.bf16.msra.mxu0 %v4474_v43 }
 0x147   : > { %1742 = vmatprep.subr.bf16.mxu1 %v5814_v23  ;;  %1627 = vmatprep.subr.bf16.mxu0 %v5814_v23 }
 0x14a   : > { %1743 = vmatpush1.bf16.msra.mxu1 %v4471_v26  ;;  %1628 = vmatpush1.bf16.msra.mxu0 %v4476_v44 }
 0x14b   : > { %1744 = vmatprep.subr.bf16.mxu1 %v5814_v23  ;;  %1629 = vmatprep.subr.bf16.mxu0 %v5814_v23 }
 0x14e   : > { %1745 = vmatpush1.bf16.msra.mxu1 %v4473_v58  ;;  %1630 = vmatpush1.bf16.msra.mxu0 %v4478_v27  ;;  %v4494_v58 = vld [vmem:[%s5798_s3 + $0x278] sm:$0xff]  }
 0x14f   : > { %1746 = vmatprep.subr.bf16.mxu1 %v5814_v23  ;;  %1631 = vmatprep.subr.bf16.mxu0 %v5814_v23 }
 0x152   : > { %1747 = vmatpush1.bf16.msra.mxu1 %v4475_v45  ;;  %1632 = vmatpush1.bf16.msra.mxu0 %v4480_v29  ;;  %v4495_v45 = vld [vmem:[%s5798_s3 + $0x200] sm:$0xff]   ;;  %v4498_v29 = vld [vmem:[%s5798_s3 + $0x268] sm:$0xff]  }
 0x153   : > { %1748 = vmatprep.subr.bf16.mxu1 %v5814_v23  ;;  %1633 = vmatprep.subr.bf16.mxu0 %v5814_v23 }
 0x156   : > { %1749 = vmatpush1.bf16.msra.mxu1 %v4477_v39  ;;  %1634 = vmatpush1.bf16.msra.mxu0 %v4482_v59  ;;  %v4496_v39 = vld [vmem:[%s5798_s3 + $0x270] sm:$0xff]   ;;  %v4500_v59 = vld [vmem:[%s5798_s3 + $0x260] sm:$0xff]  }
 0x157   : > { %1750 = vmatprep.subr.bf16.mxu1 %v5814_v23  ;;  %1635 = vmatprep.subr.bf16.mxu0 %v5814_v23 }
 0x15a   : > { %1751 = vmatpush1.bf16.msra.mxu1 %v4479_v41  ;;  %1636 = vmatpush1.bf16.msra.mxu0 %v4484_v11  ;;  %v4497_v41 = vld [vmem:[%s5798_s3 + $0x1f8] sm:$0xff]  }
 0x15b   : > { %1760 = vmatprep.subr.bf16.mxu1 %v5814_v23  ;;  %1645 = vmatprep.subr.bf16.mxu0 %v5814_v23  ;;  %v4502_v11 = vld [vmem:[%s5798_s3 + $0x258] sm:$0xff]  }
 0x15e   : > { %1761 = vmatpush2.bf16.msra.mxu1 %v4481_v46  ;;  %1646 = vmatpush2.bf16.msra.mxu0 %v4486_v32  ;;  %v4499_v46 = vld [vmem:[%s5798_s3 + $0x1f0] sm:$0xff]  }
 0x15f   : > { %1762 = vmatprep.subr.bf16.mxu1 %v5814_v23  ;;  %1647 = vmatprep.subr.bf16.mxu0 %v5814_v23  ;;  %v4504_v32 = vld [vmem:[%s5798_s3 + $0x250] sm:$0xff]  }
 0x162   : > { %1763 = vmatpush2.bf16.msra.mxu1 %v4483_v60  ;;  %1648 = vmatpush2.bf16.msra.mxu0 %v4488_v13  ;;  %v4501_v60 = vld [vmem:[%s5798_s3 + $0x1e8] sm:$0xff]  }
 0x163   : > { %1764 = vmatprep.subr.bf16.mxu1 %v5814_v23  ;;  %1649 = vmatprep.subr.bf16.mxu0 %v5814_v23  ;;  %v4506_v13 = vld [vmem:[%s5798_s3 + $0x248] sm:$0xff]  }
 0x166   : > { %1765 = vmatpush2.bf16.msra.mxu1 %v4485_v30  ;;  %1650 = vmatpush2.bf16.msra.mxu0 %v4490_v33  ;;  %v4503_v30 = vld [vmem:[%s5798_s3 + $0x1e0] sm:$0xff]   ;;  %v4507_v33 = vld [vmem:[%s5798_s3 + $0x230] sm:$0xff]  }
 0x167   : > { %1766 = vmatprep.subr.bf16.mxu1 %v5814_v23  ;;  %1651 = vmatprep.subr.bf16.mxu0 %v5814_v23 }
 0x16a   : > { %1767 = vmatpush2.bf16.msra.mxu1 %v4487_v5  ;;  %1652 = vmatpush2.bf16.msra.mxu0 %v4492_v47  ;;  %v4505_v5 = vld [vmem:[%s5798_s3 + $0x238] sm:$0xff]   ;;  %v4508_v47 = vld [vmem:[%s5798_s3 + $0x240] sm:$0xff]  }
 0x16b   : > { %1985 = vmatprep.subr.bf16.mxu1 %v5814_v23  ;;  %1873 = vmatprep.subr.bf16.mxu0 %v5814_v23 }
 0x1fb   : > { %v1323_v63 = vpop.f32.mrf.mxu0  ;;  %v1406_v0 = vpop.f32.mrf.mxu1 }
 0x1fc   : > { %v1417_v17 = vmax.f32 %v1323_v63, %v1406_v0  ;;  %v4512_v0 = vld [vmem:[%s5798_s3 + $0x290] sm:$0xff]  }
 0x1fd   : > { %v1325_v35 = vpop.f32.mrf.mxu0  ;;  %v1408_v50 = vpop.f32.mrf.mxu1 }
 0x1fe   : > { %v1433_v37 = vadd.f32 %v1426_v62, %v1417_v17  ;;  %v1418_v52 = vmax.f32 %v1325_v35, %v1408_v50  ;;  %v4514_v50 = vld [vmem:[%s5798_s3 + $0x288] sm:$0xff]  }
 0x1ff   : > { %v1329_v1 = vpop.f32.mrf.mxu0  ;;  %v1412_v12 = vpop.f32.mrf.mxu1 }
 0x200   : > { %v1437_v14 = vmax.f32 %v1433_v37, 0.0  ;;  %v1434_v16 = vadd.f32 %v1430_v36, %v1418_v52  ;;  %v1419_v18 = vmax.f32 %v1329_v1, %v1412_v12  ;;  %v4515_v37 = vld [vmem:[%s5798_s3 + $0x2d0] sm:$0xff]   ;;  %v4516_v52 = vld [vmem:[%s5798_s3 + $0x280] sm:$0xff]   ;;  %v4517_v1 = vld [vmem:[%s5798_s3 + $0x2c8] sm:$0xff]  }
 0x201   : > { %v1331_v15 = vpop.f32.mrf.mxu0  ;;  %v1414_v34 = vpop.f32.mrf.mxu1  ;;  %v4518_v12 = vld [vmem:[%s5798_s3 + $0xf8] sm:$0xff]  }
 0x202   : > { %1441 = vst [vmem:[#allocation2] sm:$0xff] %v1437_v14  ;;  %v1438_v53 = vmax.f32 %v1434_v16, 0.0  ;;  %v1435_v9 = vadd.f32 %v1426_v62, %v1419_v18  ;;  %v1420_v2 = vmax.f32 %v1331_v15, %v1414_v34  ;;  %v5192_v55 = vpack.c.bf16 %v1437_v14, %v1437_v14  ;;  %v4511_v62 = vld [vmem:[%s5798_s3 + $0x220] sm:$0xff]   ;;  %v4520_v16 = vld [vmem:[%s5798_s3 + $0xf0] sm:$0xff]   ;;  %v4521_v18 = vld [vmem:[%s5798_s3 + $0x2b8] sm:$0xff]  }
 0x203   : > { %v4519_v14 = vld [vmem:[%s5798_s3 + $0x2c0] sm:$0xff]   ;;  %v4522_v15 = vld [vmem:[%s5798_s3 + $0xe8] sm:$0xff]   ;;  %v4523_v34 = vld [vmem:[%s5798_s3 + $0x2b0] sm:$0xff]  }
 0x204   : > { %1443 = vst.msk [vmem:[#allocation2 + $0x8] sm:$0xff] %vm1442_vm7, %v1438_v53  ;;  %v1439_v19 = vmax.f32 %v1435_v9, 0.0  ;;  %v1436_v20 = vadd.f32 %v1430_v36, %v1420_v2  ;;  %v4513_v36 = vld [vmem:[%s5798_s3 + $0x2d8] sm:$0xff]   ;;  %v4524_v53 = vld [vmem:[%s5798_s3 + $0xe0] sm:$0xff]   ;;  %v4525_v9 = vld [vmem:[%s5798_s3 + $0x2a8] sm:$0xff]  }
 0x205   : > { %v4526_v2 = vld [vmem:[%s5798_s3 + $0xd8] sm:$0xff]  }
 0x206   : > { %1444 = vst [vmem:[#allocation2 + $0x10] sm:$0xf] %v1439_v19  ;;  %v1440_v25 = vmax.f32 %v1436_v20, 0.0  ;;  %v4527_v19 = vld [vmem:[%s5798_s3 + $0x2a0] sm:$0xff]   ;;  %v4528_v20 = vld [vmem:[%s5798_s3 + $0xd0] sm:$0xff]  }
 0x208   : > { %1446 = vst.msk [vmem:[#allocation2 + $0x18] sm:$0xf] %vm1445_vm8, %v1440_v25  ;;  %v4529_v25 = vld [vmem:[%s5798_s3 + $0x2f8] sm:$0xff]  }
 0x209   : > { %v1500_v56 = vld [vmem:[#allocation2] sm:$0xfe] }
 0x20b   : > { %v1448_v54 = vld [vmem:[#allocation2 + $0x8] sm:$0xff] }
 0x20c   : > { %v1450_v4 = vpack.c.bf16 %v1448_v54, %v1448_v54  ;;  %v1501_v22 = vld [vmem:[#allocation2 + $0x8] sm:$0xfe] }
 0x20d   : > { %v1502_v57 = vld [vmem:[#allocation2 + $0x10] sm:$0x1]  ;;  %v2026_v63 = vld [vmem:[#allocation2 + $0x8] sm:$0xfc] }
 0x20e   : > { %3849 = vmatprep.mubr.msk.bf16.mxu1 %vm1442_vm7, %v1450_v4  ;;  %v1504_v51 = vpack.c.bf16 %v1502_v57, %v1500_v56  ;;  %v4530_v54 = vld [vmem:[%s5798_s3 + $0xc8] sm:$0xff]   ;;  %v4532_v56 = vld [vmem:[%s5798_s3 + $0xc0] sm:$0xff]  }
 0x20f   : > { %1769 = vmatmul.mubr.bf16.vlgmr.msra.gmra.mxu1 %v5192_v55  ;;  %v1503_v6 = vld [vmem:[#allocation2 + $0x18] sm:$0x1] }
 0x210   : > { %1986 = vmatpush1.bf16.msra.mxu1 %v4489_v21  ;;  %3899 = vmatprep.mubr.msk.bf16.mxu1 %vm1442_vm7, %v1450_v4  ;;  %v1505_v7 = vpack.c.bf16 %v1503_v6, %v1501_v22  ;;  %v1534_v8 = vshll.u32 %v1504_v51, 16  ;;  %v1532_v26 = vshrl.u32 %v1504_v51, 16  ;;  %v2028_v61 = vld [vmem:[#allocation2 + $0x18] sm:$0x3]  ;;  %v4531_v21 = vld [vmem:[%s5798_s3 + $0x2f0] sm:$0xff]   ;;  %v4533_v51 = vld [vmem:[%s5798_s3 + $0x2e8] sm:$0xff]  }
 0x211   : > { %1987 = vmatprep.subr.bf16.mxu1 %v5814_v23  ;;  %v2030_v17 = vpack.c.bf16 %v2028_v61, %v2026_v63  ;;  %v2318_v4 = vld [vmem:[#allocation2 + $0x18] sm:$0x7]  ;;  %v2027_v6 = vld [vmem:[#allocation2 + $0x10] sm:$0x3]  ;;  %v2315_v63 = vld [vmem:[#allocation2] sm:$0xf8] }
 0x212   : > { %v1541_v10 = vshll.u32 %v1505_v7, 16  ;;  %v1536_v42 = vrot.slane %v1534_v8, 1  ;;  %v1539_v24 = vshrl.u32 %v1505_v7, 16  ;;  %v4534_v22 = vld [vmem:[%s5798_s3 + $0x118] sm:$0xff]   ;;  %v4535_v8 = vld [vmem:[%s5798_s3 + $0x2e0] sm:$0xff]  }
 0x213   : > { %v2059_v35 = vrot.slane %v2030_v17, 1  ;;  %v2317_v61 = vld [vmem:[#allocation2 + $0x10] sm:$0x7]  ;;  %v4556_v17 = vld [vmem:[%s5798_s3 + $0x120] sm:$0xff]  }
 0x214   : > { %1988 = vmatpush1.bf16.msra.mxu1 %v4491_v38  ;;  %v1543_v43 = vrot.slane %v1541_v10, 1  ;;  %v5208_v27 = vor.u32 %v1536_v42, %v1532_v26  ;;  %v2025_v10 = vld [vmem:[#allocation2] sm:$0xfc]  ;;  %v4537_v26 = vld [vmem:[%s5798_s3 + $0x338] sm:$0xff]  }
 0x215   : > { %1989 = vmatprep.subr.bf16.mxu1 %v5814_v23  ;;  %v2029_v42 = vpack.c.bf16 %v2027_v6, %v2025_v10  ;;  %v4574_v6 = vld [vmem:[%s5798_s3 + $0x198] sm:$0xff]   ;;  %v4578_v10 = vld [vmem:[%s5798_s3 + $0x188] sm:$0xff]  }
 0x216   : > { %v1544_v44 = vor.u32 %v1543_v43, %v1539_v24 }
 0x218   : > { %1990 = vmatpush1.bf16.msra.mxu1 %v4493_v40  ;;  %3836 = vmatprep.mubr.msk.bf16.mxu0 %vm1442_vm7, %v1544_v44  ;;  %v4536_v40 = vld [vmem:[%s5798_s3 + $0x110] sm:$0xff]  }
 0x219   : > { %1654 = vmatmul.mubr.bf16.vlgmr.msra.gmra.mxu0 %v5208_v27  ;;  %1991 = vmatprep.subr.bf16.mxu1 %v5814_v23 }
 0x21a   : > { %1874 = vmatpush1.bf16.msra.mxu0 %v4494_v58  ;;  %3886 = vmatprep.mubr.msk.bf16.mxu0 %vm1442_vm7, %v1544_v44  ;;  %v2058_v44 = vrot.slane %v2029_v42, 1  ;;  %v4579_v42 = vld [vmem:[%s5798_s3 + $0x3b0] sm:$0xff]  }
 0x21b   : > { %1875 = vmatprep.subr.bf16.mxu0 %v5814_v23 }
 0x21c   : > { %1992 = vmatpush1.bf16.msra.mxu1 %v4495_v45  ;;  %v4539_v45 = vld [vmem:[%s5798_s3 + $0x330] sm:$0xff]  }
 0x21d   : > { %1993 = vmatprep.subr.bf16.mxu1 %v5814_v23 }
 0x21e   : > { %1876 = vmatpush1.bf16.msra.mxu0 %v4496_v39  ;;  %v4540_v39 = vld [vmem:[%s5798_s3 + $0x100] sm:$0xff]  }
 0x21f   : > { %1877 = vmatprep.subr.bf16.mxu0 %v5814_v23 }
 0x220   : > { %1994 = vmatpush1.bf16.msra.mxu1 %v4497_v41  ;;  %v4541_v41 = vld [vmem:[%s5798_s3 + $0x328] sm:$0xff]  }
 0x221   : > { %1995 = vmatprep.subr.bf16.mxu1 %v5814_v23 }
 0x222   : > { %1878 = vmatpush1.bf16.msra.mxu0 %v4498_v29  ;;  %v4542_v29 = vld [vmem:[%s5798_s3 + $0x158] sm:$0xff]  }
 0x223   : > { %1879 = vmatprep.subr.bf16.mxu0 %v5814_v23 }
 0x224   : > { %1996 = vmatpush1.bf16.msra.mxu1 %v4499_v46  ;;  %v4543_v46 = vld [vmem:[%s5798_s3 + $0x320] sm:$0xff]  }
 0x225   : > { %1997 = vmatprep.subr.bf16.mxu1 %v5814_v23 }
 0x226   : > { %1880 = vmatpush1.bf16.msra.mxu0 %v4500_v59  ;;  %v4544_v59 = vld [vmem:[%s5798_s3 + $0x150] sm:$0xff]  }
 0x227   : > { %1881 = vmatprep.subr.bf16.mxu0 %v5814_v23 }
 0x228   : > { %1998 = vmatpush1.bf16.msra.mxu1 %v4501_v60  ;;  %v4545_v60 = vld [vmem:[%s5798_s3 + $0x318] sm:$0xff]  }
 0x229   : > { %1999 = vmatprep.subr.bf16.mxu1 %v5814_v23 }
 0x22a   : > { %1882 = vmatpush1.bf16.msra.mxu0 %v4502_v11  ;;  %v4546_v11 = vld [vmem:[%s5798_s3 + $0x148] sm:$0xff]  }
 0x22b   : > { %1883 = vmatprep.subr.bf16.mxu0 %v5814_v23 }
 0x22c   : > { %2000 = vmatpush1.bf16.msra.mxu1 %v4503_v30  ;;  %v4547_v30 = vld [vmem:[%s5798_s3 + $0x310] sm:$0xff]  }
 0x22d   : > { %2009 = vmatprep.subr.bf16.mxu1 %v5814_v23 }
 0x22e   : > { %1884 = vmatpush1.bf16.msra.mxu0 %v4504_v32  ;;  %v4548_v32 = vld [vmem:[%s5798_s3 + $0x140] sm:$0xff]  }
 0x22f   : > { %1885 = vmatprep.subr.bf16.mxu0 %v5814_v23 }
 0x230   : > { %2010 = vmatpush2.bf16.msra.mxu1 %v4505_v5  ;;  %v4549_v5 = vld [vmem:[%s5798_s3 + $0x308] sm:$0xff]  }
 0x231   : > { %2011 = vmatprep.subr.bf16.mxu1 %v5814_v23 }
 0x232   : > { %1886 = vmatpush1.bf16.msra.mxu0 %v4506_v13  ;;  %v4550_v13 = vld [vmem:[%s5798_s3 + $0x138] sm:$0xff]  }
 0x233   : > { %1887 = vmatprep.subr.bf16.mxu0 %v5814_v23 }
 0x234   : > { %2012 = vmatpush2.bf16.msra.mxu1 %v4507_v33  ;;  %v4551_v33 = vld [vmem:[%s5798_s3 + $0x300] sm:$0xff]  }
 0x235   : > { %2013 = vmatprep.subr.bf16.mxu1 %v5814_v23 }
 0x236   : > { %1888 = vmatpush1.bf16.msra.mxu0 %v4508_v47  ;;  %v4552_v47 = vld [vmem:[%s5798_s3 + $0x130] sm:$0xff]  }
 0x237   : > { %1897 = vmatprep.subr.bf16.mxu0 %v5814_v23 }
 0x238   : > { %2014 = vmatpush2.bf16.msra.mxu1 %v4509_v48  ;;  %v4553_v48 = vld [vmem:[%s5798_s3 + $0x358] sm:$0xff]  }
 0x239   : > { %2015 = vmatprep.subr.bf16.mxu1 %v5814_v23 }
 0x23a   : > { %1898 = vmatpush2.bf16.msra.mxu0 %v4510_v49  ;;  %v4554_v49 = vld [vmem:[%s5798_s3 + $0x128] sm:$0xff]  }
 0x23b   : > { %1899 = vmatprep.subr.bf16.mxu0 %v5814_v23 }
 0x23c   : > { %2016 = vmatpush2.bf16.msra.mxu1 %v4511_v62  ;;  %v4555_v62 = vld [vmem:[%s5798_s3 + $0x350] sm:$0xff]  }
 0x23d   : > { %2274 = vmatprep.subr.bf16.mxu1 %v5814_v23 }
 0x23e   : > { %1900 = vmatpush2.bf16.msra.mxu0 %v4512_v0  ;;  %v2319_v0 = vpack.c.bf16 %v2317_v61, %v2315_v63 }
 0x23f   : > { %2018 = vmatmul.mubr.bf16.vlgmr.msra.gmra.mxu1 %v5192_v55  ;;  %1901 = vmatprep.subr.bf16.mxu0 %v5814_v23  ;;  %v2316_v55 = vld [vmem:[#allocation2 + $0x8] sm:$0xf8] }
 0x240   : > { %2275 = vmatpush1.bf16.msra.mxu1 %v4513_v36  ;;  %3973 = vmatprep.mubr.msk.bf16.mxu1 %vm1442_vm7, %v2059_v35  ;;  %v2320_v57 = vpack.c.bf16 %v2318_v4, %v2316_v55  ;;  %v4557_v36 = vld [vmem:[%s5798_s3 + $0x348] sm:$0xff]   ;;  %v4567_v4 = vld [vmem:[%s5798_s3 + $0x380] sm:$0xff]   ;;  %v4569_v55 = vld [vmem:[%s5798_s3 + $0x378] sm:$0xff]  }
 0x241   : > { %2276 = vmatprep.subr.bf16.mxu1 %v5814_v23 }
 0x242   : > { %1902 = vmatpush2.bf16.msra.mxu0 %v4514_v50  ;;  %v2355_v38 = vshrl.u32 %v2320_v57, 16  ;;  %v2358_v7 = vshll.u32 %v2320_v57, 16  ;;  %v2350_v50 = vshll.u32 %v2319_v0, 16  ;;  %v4571_v57 = vld [vmem:[%s5798_s3 + $0x370] sm:$0xff]  }
 0x243   : > { %1903 = vmatprep.subr.bf16.mxu0 %v5814_v23 }
 0x244   : > { %2277 = vmatpush1.bf16.msra.mxu1 %v4515_v37  ;;  %v2357_v24 = vrot.slane %v2355_v38, 1  ;;  %v2360_v43 = vrot.slane %v2358_v7, 2  ;;  %v4558_v37 = vld [vmem:[%s5798_s3 + $0x178] sm:$0xff]   ;;  %v4575_v38 = vld [vmem:[%s5798_s3 + $0x360] sm:$0xff]   ;;  %v4576_v7 = vld [vmem:[%s5798_s3 + $0x190] sm:$0xff]  }
 0x245   : > { %2278 = vmatprep.subr.bf16.mxu1 %v5814_v23 }
 0x246   : > { %1904 = vmatpush2.bf16.msra.mxu0 %v4516_v52  ;;  %v2361_v58 = vor.u32 %v2360_v43, %v2357_v24  ;;  %v2620_v52 = vld [vmem:[#allocation2 + $0x18] sm:$0xf]  ;;  %v4581_v24 = vld [vmem:[%s5798_s3 + $0x3a8] sm:$0xff]  }
 0x247   : > { %2136 = vmatprep.subr.bf16.mxu0 %v5814_v23  ;;  %v4582_v43 = vld [vmem:[%s5798_s3 + $0x1d8] sm:$0xff]  }
 0x248   : > { %2279 = vmatpush1.bf16.msra.mxu1 %v4517_v1  ;;  %v4559_v1 = vld [vmem:[%s5798_s3 + $0x340] sm:$0xff]  }
 0x249   : > { %1906 = vmatmul.mubr.bf16.vlgmr.msra.gmra.mxu0 %v5208_v27  ;;  %2280 = vmatprep.subr.bf16.mxu1 %v5814_v23  ;;  %v4538_v27 = vld [vmem:[%s5798_s3 + $0x108] sm:$0xff]  }
 0x24a   : > { %2137 = vmatpush1.bf16.msra.mxu0 %v4518_v12  ;;  %3936 = vmatprep.mubr.msk.bf16.mxu0 %vm1442_vm7, %v2059_v35  ;;  %v2347_v35 = vshrl.u32 %v2319_v0, 16 }
 0x24b   : > { %2138 = vmatprep.subr.bf16.mxu0 %v5814_v23 }
 0x24c   : > { %2281 = vmatpush1.bf16.msra.mxu1 %v4519_v14  ;;  %v2349_v12 = vrot.slane %v2347_v35, 1  ;;  %v2352_v14 = vrot.slane %v2350_v50, 2 }
 0x24d   : > { %2282 = vmatprep.subr.bf16.mxu1 %v5814_v23 }
 0x24e   : > { %2139 = vmatpush1.bf16.msra.mxu0 %v4520_v16  ;;  %v2618_v16 = vld [vmem:[#allocation2 + $0x8] sm:$0xf0] }
 0x24f   : > { %2140 = vmatprep.subr.bf16.mxu0 %v5814_v23 }
 0x250   : > { %2283 = vmatpush1.bf16.msra.mxu1 %v4521_v18  ;;  %v4560_v18 = vld [vmem:[%s5798_s3 + $0x170] sm:$0xff]  }
 0x251   : > { %2284 = vmatprep.subr.bf16.mxu1 %v5814_v23 }
 0x252   : > { %2141 = vmatpush1.bf16.msra.mxu0 %v4522_v15  ;;  %v2622_v15 = vpack.c.bf16 %v2620_v52, %v2618_v16 }
 0x253   : > { %2142 = vmatprep.subr.bf16.mxu0 %v5814_v23 }
 0x254   : > { %2285 = vmatpush1.bf16.msra.mxu1 %v4523_v34  ;;  %v4561_v34 = vld [vmem:[%s5798_s3 + $0x398] sm:$0xff]  }
 0x255   : > { %2286 = vmatprep.subr.bf16.mxu1 %v5814_v23 }
 0x256   : > { %2143 = vmatpush1.bf16.msra.mxu0 %v4524_v53  ;;  %v2353_v53 = vor.u32 %v2352_v14, %v2349_v12 }
 0x257   : > { %2144 = vmatprep.subr.bf16.mxu0 %v5814_v23 }
 0x258   : > { %2287 = vmatpush1.bf16.msra.mxu1 %v4525_v9  ;;  %v2651_v9 = vrot.slane %v2622_v15, 2 }
 0x259   : > { %2288 = vmatprep.subr.bf16.mxu1 %v5814_v23 }
 0x25a   : > { %2145 = vmatpush1.bf16.msra.mxu0 %v4526_v2  ;;  %v4562_v2 = vld [vmem:[%s5798_s3 + $0x168] sm:$0xff]  }
 0x25b   : > { %2146 = vmatprep.subr.bf16.mxu0 %v5814_v23 }
 0x25c   : > { %2289 = vmatpush1.bf16.msra.mxu1 %v4527_v19  ;;  %v4563_v19 = vld [vmem:[%s5798_s3 + $0x390] sm:$0xff]  }
 0x25d   : > { %2298 = vmatprep.subr.bf16.mxu1 %v5814_v23 }
 0x25e   : > { %2147 = vmatpush1.bf16.msra.mxu0 %v4528_v20  ;;  %v4564_v20 = vld [vmem:[%s5798_s3 + $0x160] sm:$0xff]  }
 0x25f   : > { %2148 = vmatprep.subr.bf16.mxu0 %v5814_v23 }
 0x260   : > { %2299 = vmatpush2.bf16.msra.mxu1 %v4529_v25  ;;  %v4565_v25 = vld [vmem:[%s5798_s3 + $0x388] sm:$0xff]  }
 0x261   : > { %2300 = vmatprep.subr.bf16.mxu1 %v5814_v23 }
 0x262   : > { %2149 = vmatpush1.bf16.msra.mxu0 %v4530_v54  ;;  %v4566_v54 = vld [vmem:[%s5798_s3 + $0x1b8] sm:$0xff]  }
 0x263   : > { %2150 = vmatprep.subr.bf16.mxu0 %v5814_v23 }
 0x264   : > { %2301 = vmatpush2.bf16.msra.mxu1 %v4531_v21  ;;  %v4568_v21 = vld [vmem:[%s5798_s3 + $0x1b0] sm:$0xff]  }
 0x265   : > { %2302 = vmatprep.subr.bf16.mxu1 %v5814_v23 }
 0x266   : > { %2151 = vmatpush1.bf16.msra.mxu0 %v4532_v56  ;;  %v4570_v56 = vld [vmem:[%s5798_s3 + $0x1a8] sm:$0xff]  }
 0x267   : > { %2160 = vmatprep.subr.bf16.mxu0 %v5814_v23 }
 0x268   : > { %2303 = vmatpush2.bf16.msra.mxu1 %v4533_v51  ;;  %v4572_v51 = vld [vmem:[%s5798_s3 + $0x1a0] sm:$0xff]  }
 0x269   : > { %2304 = vmatprep.subr.bf16.mxu1 %v5814_v23 }
 0x26a   : > { %2161 = vmatpush2.bf16.msra.mxu0 %v4534_v22  ;;  %v4573_v22 = vld [vmem:[%s5798_s3 + $0x368] sm:$0xff]  }
 0x26b   : > { %2162 = vmatprep.subr.bf16.mxu0 %v5814_v23 }
 0x26c   : > { %2305 = vmatpush2.bf16.msra.mxu1 %v4535_v8  ;;  %v4577_v8 = vld [vmem:[%s5798_s3 + $0x3b8] sm:$0xff]  }
 0x26d   : > { %2576 = vmatprep.subr.bf16.mxu1 %v5814_v23 }
 0x26e   : > { %2163 = vmatpush2.bf16.msra.mxu0 %v4536_v40  ;;  %v4580_v40 = vld [vmem:[%s5798_s3 + $0x180] sm:$0xff]  }
 0x26f   : > { %2307 = vmatmul.mubr.bf16.vlgmr.msra.gmra.mxu1 %v2058_v44  ;;  %2164 = vmatprep.subr.bf16.mxu0 %v5814_v23 }
 0x270   : > { %2577 = vmatpush1.bf16.msra.mxu1 %v4537_v26  ;;  %4047 = vmatprep.mubr.msk.bf16.mxu1 %vm1442_vm7, %v2361_v58  ;;  %v2619_v26 = vld [vmem:[#allocation2 + $0x10] sm:$0xf] }
 0x271   : > { %2578 = vmatprep.subr.bf16.mxu1 %v5814_v23 }
 0x272   : > { %2165 = vmatpush2.bf16.msra.mxu0 %v4538_v27 }
 0x273   : > { %2166 = vmatprep.subr.bf16.mxu0 %v5814_v23 }
 0x274   : > { %2579 = vmatpush1.bf16.msra.mxu1 %v4539_v45  ;;  %v4584_v45 = vld [vmem:[%s5798_s3 + $0x1d0] sm:$0xff]  }
 0x275   : > { %2580 = vmatprep.subr.bf16.mxu1 %v5814_v23 }
 0x276   : > { %2167 = vmatpush2.bf16.msra.mxu0 %v4540_v39 }
 0x277   : > { %2438 = vmatprep.subr.bf16.mxu0 %v5814_v23 }
 0x278   : > { %2581 = vmatpush1.bf16.msra.mxu1 %v4541_v41  ;;  %v4585_v41 = vld [vmem:[%s5798_s3 + $0x1c8] sm:$0xff]  }
 0x279   : > { %2169 = vmatmul.mubr.bf16.vlgmr.msra.gmra.mxu0 %v2058_v44  ;;  %2582 = vmatprep.subr.bf16.mxu1 %v5814_v23  ;;  %v4583_v44 = vld [vmem:[%s5798_s3 + $0x3a0] sm:$0xff]  }
 0x27a   : > { %2439 = vmatpush1.bf16.msra.mxu0 %v4542_v29  ;;  %4010 = vmatprep.mubr.msk.bf16.mxu0 %vm1442_vm7, %v2361_v58  ;;  %v2617_v58 = vld [vmem:[#allocation2] sm:$0xf0] }
 0x27b   : > { %2440 = vmatprep.subr.bf16.mxu0 %v5814_v23  ;;  %v2621_v27 = vpack.c.bf16 %v2619_v26, %v2617_v58  ;;  %v4593_v26 = vld [vmem:[%s5800_s5 + $0x20] sm:$0xff]   ;;  %v4595_v58 = vld [vmem:[%s5800_s5 + $0x18] sm:$0xff]  }
 0x27c   : > { %2583 = vmatpush1.bf16.msra.mxu1 %v4543_v46 }
 0x27d   : > { %2584 = vmatprep.subr.bf16.mxu1 %v5814_v23  ;;  %v2650_v39 = vrot.slane %v2621_v27, 2  ;;  %v4596_v27 = vld [vmem:[%s5800_s5 + $0x58] sm:$0xff]  }
 0x27e   : > { %2441 = vmatpush1.bf16.msra.mxu0 %v4544_v59  ;;  %v4586_v59 = vld [vmem:[%s5798_s3 + $0x1c0] sm:$0xff]  }
 0x27f   : > { %2442 = vmatprep.subr.bf16.mxu0 %v5814_v23 }
 0x280   : > { %2585 = vmatpush1.bf16.msra.mxu1 %v4545_v60 }
 0x281   : > { %2586 = vmatprep.subr.bf16.mxu1 %v5814_v23 }
 0x282   : > { %2443 = vmatpush1.bf16.msra.mxu0 %v4546_v11 }
 0x283   : > { %2444 = vmatprep.subr.bf16.mxu0 %v5814_v23 }
 0x284   : > { %2587 = vmatpush1.bf16.msra.mxu1 %v4547_v30 }
 0x285   : > { %2588 = vmatprep.subr.bf16.mxu1 %v5814_v23 }
 0x286   : > { %2445 = vmatpush1.bf16.msra.mxu0 %v4548_v32 }
 0x287   : > { %2446 = vmatprep.subr.bf16.mxu0 %v5814_v23 }
 0x288   : > { %2589 = vmatpush1.bf16.msra.mxu1 %v4549_v5 }
 0x289   : > { %2590 = vmatprep.subr.bf16.mxu1 %v5814_v23 }
 0x28a   : > { %2447 = vmatpush1.bf16.msra.mxu0 %v4550_v13 }
 0x28b   : > { %2448 = vmatprep.subr.bf16.mxu0 %v5814_v23 }
 0x28c   : > { %2591 = vmatpush1.bf16.msra.mxu1 %v4551_v33 }
 0x28d   : > { %2600 = vmatprep.subr.bf16.mxu1 %v5814_v23 }
 0x28e   : > { %2449 = vmatpush1.bf16.msra.mxu0 %v4552_v47 }
 0x28f   : > { %2450 = vmatprep.subr.bf16.mxu0 %v5814_v23 }
 0x290   : > { %2601 = vmatpush2.bf16.msra.mxu1 %v4553_v48 }
 0x291   : > { %2602 = vmatprep.subr.bf16.mxu1 %v5814_v23 }
 0x292   : > { %2451 = vmatpush1.bf16.msra.mxu0 %v4554_v49 }
 0x293   : > { %2452 = vmatprep.subr.bf16.mxu0 %v5814_v23 }
 0x294   : > { %2603 = vmatpush2.bf16.msra.mxu1 %v4555_v62 }
 0x295   : > { %2604 = vmatprep.subr.bf16.mxu1 %v5814_v23 }
 0x296   : > { %2453 = vmatpush1.bf16.msra.mxu0 %v4556_v17 }
 0x297   : > { %2462 = vmatprep.subr.bf16.mxu0 %v5814_v23 }
 0x298   : > { %2605 = vmatpush2.bf16.msra.mxu1 %v4557_v36 }
 0x299   : > { %2606 = vmatprep.subr.bf16.mxu1 %v5814_v23 }
 0x29a   : > { %2463 = vmatpush2.bf16.msra.mxu0 %v4558_v37 }
 0x29b   : > { %2464 = vmatprep.subr.bf16.mxu0 %v5814_v23 }
 0x29c   : > { %2607 = vmatpush2.bf16.msra.mxu1 %v4559_v1 }
 0x29d   : > { %2866 = vmatprep.subr.bf16.mxu1 %v5814_v23 }
 0x29e   : > { %2465 = vmatpush2.bf16.msra.mxu0 %v4560_v18 }
 0x29f   : > { %2609 = vmatmul.mubr.bf16.vlgmr.msra.gmra.mxu1 %v2353_v53  ;;  %2466 = vmatprep.subr.bf16.mxu0 %v5814_v23 }
 0x2a0   : > { %2867 = vmatpush1.bf16.msra.mxu1 %v4561_v34  ;;  %4121 = vmatprep.mubr.msk.bf16.mxu1 %vm1442_vm7, %v2651_v9 }
 0x2a1   : > { %2868 = vmatprep.subr.bf16.mxu1 %v5814_v23 }
 0x2a2   : > { %2467 = vmatpush2.bf16.msra.mxu0 %v4562_v2 }
 0x2a3   : > { %2468 = vmatprep.subr.bf16.mxu0 %v5814_v23 }
 0x2a4   : > { %2869 = vmatpush1.bf16.msra.mxu1 %v4563_v19 }
 0x2a5   : > { %2870 = vmatprep.subr.bf16.mxu1 %v5814_v23 }
 0x2a6   : > { %2469 = vmatpush2.bf16.msra.mxu0 %v4564_v20 }
 0x2a7   : > { %2728 = vmatprep.subr.bf16.mxu0 %v5814_v23 }
 0x2a8   : > { %2871 = vmatpush1.bf16.msra.mxu1 %v4565_v25 }
 0x2a9   : > { %2471 = vmatmul.mubr.bf16.vlgmr.msra.gmra.mxu0 %v2353_v53  ;;  %2872 = vmatprep.subr.bf16.mxu1 %v5814_v23 }
 0x2aa   : > { %2729 = vmatpush1.bf16.msra.mxu0 %v4566_v54  ;;  %4084 = vmatprep.mubr.msk.bf16.mxu0 %vm1442_vm7, %v2651_v9 }
 0x2ab   : > { %2730 = vmatprep.subr.bf16.mxu0 %v5814_v23 }
 0x2ac   : > { %2873 = vmatpush1.bf16.msra.mxu1 %v4567_v4 }
 0x2ad   : > { %2874 = vmatprep.subr.bf16.mxu1 %v5814_v23 }
 0x2ae   : > { %2731 = vmatpush1.bf16.msra.mxu0 %v4568_v21 }
 0x2af   : > { %2732 = vmatprep.subr.bf16.mxu0 %v5814_v23 }
 0x2b0   : > { %2875 = vmatpush1.bf16.msra.mxu1 %v4569_v55 }
 0x2b1   : > { %2876 = vmatprep.subr.bf16.mxu1 %v5814_v23 }
 0x2b2   : > { %2733 = vmatpush1.bf16.msra.mxu0 %v4570_v56 }
 0x2b3   : > { %2734 = vmatprep.subr.bf16.mxu0 %v5814_v23 }
 0x2b4   : > { %2877 = vmatpush1.bf16.msra.mxu1 %v4571_v57 }
 0x2b5   : > { %2878 = vmatprep.subr.bf16.mxu1 %v5814_v23 }
 0x2b6   : > { %2735 = vmatpush1.bf16.msra.mxu0 %v4572_v51 }
 0x2b7   : > { %2736 = vmatprep.subr.bf16.mxu0 %v5814_v23 }
 0x2b8   : > { %2879 = vmatpush1.bf16.msra.mxu1 %v4573_v22 }
 0x2b9   : > { %2880 = vmatprep.subr.bf16.mxu1 %v5814_v23 }
 0x2ba   : > { %2737 = vmatpush1.bf16.msra.mxu0 %v4574_v6 }
 0x2bb   : > { %2738 = vmatprep.subr.bf16.mxu0 %v5814_v23 }
 0x2bc   : > { %2881 = vmatpush1.bf16.msra.mxu1 %v4575_v38 }
 0x2bd   : > { %2890 = vmatprep.subr.bf16.mxu1 %v5814_v23 }
 0x2be   : > { %2739 = vmatpush1.bf16.msra.mxu0 %v4576_v7 }
 0x2bf   : > { %2740 = vmatprep.subr.bf16.mxu0 %v5814_v23 }
 0x2c0   : > { %2891 = vmatpush2.bf16.msra.mxu1 %v4577_v8 }
 0x2c1   : > { %2892 = vmatprep.subr.bf16.mxu1 %v5814_v23 }
 0x2c2   : > { %2741 = vmatpush1.bf16.msra.mxu0 %v4578_v10  ;;  %v4587_v10 = vld [vmem:[%s5800_s5 + $0x38] sm:$0xff]  }
 0x2c3   : > { %2742 = vmatprep.subr.bf16.mxu0 %v5814_v23 }
 0x2c4   : > { %2893 = vmatpush2.bf16.msra.mxu1 %v4579_v42  ;;  %v4588_v42 = vld [vmem:[%s5800_s5 + $0x78] sm:$0xff]  }
 0x2c5   : > { %2894 = vmatprep.subr.bf16.mxu1 %v5814_v23 }
 0x2c6   : > { %2743 = vmatpush1.bf16.msra.mxu0 %v4580_v40 }
 0x2c7   : > { %2752 = vmatprep.subr.bf16.mxu0 %v5814_v23 }
 0x2c8   : > { %2895 = vmatpush2.bf16.msra.mxu1 %v4581_v24  ;;  %v4589_v24 = vld [vmem:[%s5800_s5 + $0x30] sm:$0xff]  }
 0x2c9   : > { %2896 = vmatprep.subr.bf16.mxu1 %v5814_v23 }
 0x2ca   : > { %2753 = vmatpush2.bf16.msra.mxu0 %v4582_v43  ;;  %v4590_v43 = vld [vmem:[%s5800_s5 + $0x70] sm:$0xff]  }
 0x2cb   : > { %2754 = vmatprep.subr.bf16.mxu0 %v5814_v23 }
 0x2cc   : > { %2897 = vmatpush2.bf16.msra.mxu1 %v4583_v44  ;;  %v4594_v44 = vld [vmem:[%s5800_s5 + $0x60] sm:$0xff]  }
 0x2cd   : > { %4264 = vmatprep.subr.mxu1 %v5813_v3 }
 0x2ce   : > { %2755 = vmatpush2.bf16.msra.mxu0 %v4584_v45  ;;  %v4597_v45 = vld [vmem:[%s5800_s5 + $0x10] sm:$0xff]  }
 0x2cf   : > { %2899 = vmatmul.mubr.bf16.vlgmr.msra.gmra.mxu1 %v2650_v39  ;;  %v1770_v29 = vpop.f32.mrf.mxu1  ;;  %2756 = vmatprep.subr.bf16.mxu0 %v5814_v23 }
 0x2d0   : > { %4266 = vmatprep.mubr.msk.f32.mxu1 %vm4691_vm9, %v5813_v3 }
 0x2d1   : > { %v1772_v46 = vpop.f32.mrf.mxu1 }
 0x2d2   : > { %2757 = vmatpush2.bf16.msra.mxu0 %v4585_v41  ;;  %v4599_v41 = vld [vmem:[%s5800_s5 + $0x8] sm:$0xff]   ;;  %v4601_v46 = vld [vmem:[%s5800_s5] sm:$0xff]  }
 0x2d3   : > { %v1773_v60 = vpop.f32.mrf.mxu1  ;;  %2758 = vmatprep.subr.bf16.mxu0 %v5814_v23 }
 0x2d5   : > { %v1774_v11 = vpop.f32.mrf.mxu1 }
 0x2d6   : > { %2759 = vmatpush2.bf16.msra.mxu0 %v4586_v59  ;;  %v4602_v59 = vld [vmem:[%s5800_s5 + $0x40] sm:$0xff]  }
 0x2d7   : > { %4259 = vmatprep.subr.mxu0 %v5813_v3 }
 0x2d9   : > { %2761 = vmatmul.mubr.bf16.vlgmr.msra.gmra.mxu0 %v2650_v39  ;;  %v1655_v30 = vpop.f32.mrf.mxu0  ;;  %v4598_v39 = vld [vmem:[%s5800_s5 + $0x50] sm:$0xff]  }
 0x2da   : > { %v1771_v32 = vadd.f32 %v1770_v29, %v1655_v30  ;;  %4261 = vmatprep.mubr.msk.f32.mxu0 %vm4691_vm9, %v5813_v3  ;;  %v4600_v29 = vld [vmem:[%s5800_s5 + $0x48] sm:$0xff]   ;;  %v4124_v30 = vld [vmem:[%s5799_s4] ss:$0 sm:$0xff] }
 0x2db   : > { %v1657_v5 = vpop.f32.mrf.mxu0 }
 0x2dd   : > { %v1658_v13 = vpop.f32.mrf.mxu0 }
 0x2df   : > { %v1659_v33 = vpop.f32.mrf.mxu0 }
 0x2ff   : > { %v2019_v47 = vpop.f32.mrf.mxu1 }
 0x301   : > { %v2021_v48 = vpop.f32.mrf.mxu1 }
 0x302   : > { %v4603_v48 = vld [vmem:[%s5800_s5 + $0xb8] sm:$0xff]  }
 0x303   : > { %v2022_v49 = vpop.f32.mrf.mxu1 }
 0x305   : > { %v2023_v61 = vpop.f32.mrf.mxu1 }
 0x309   : > { %v1907_v62 = vpop.f32.mrf.mxu0 }
 0x30a   : > { %v2020_v63 = vadd.f32 %v2019_v47, %v1907_v62  ;;  %v4604_v62 = vld [vmem:[%s5800_s5 + $0xf8] sm:$0xff]  }
 0x30b   : > { %v1909_v0 = vpop.f32.mrf.mxu0 }
 0x30d   : > { %v1910_v17 = vpop.f32.mrf.mxu0 }
 0x30e   : > { %v4605_v17 = vld [vmem:[%s5800_s5 + $0xb0] sm:$0xff]  }
 0x30f   : > { %v1911_v36 = vpop.f32.mrf.mxu0 }
 0x310   : > { %v4606_v36 = vld [vmem:[%s5800_s5 + $0xf0] sm:$0xff]  }
 0x32f   : > { %v2308_v23 = vpop.f32.mrf.mxu1 }
 0x330   : > { %v2314_v35 = vadd.f32 %v2308_v23, %v2020_v63  ;;  %v4607_v23 = vld [vmem:[%s5800_s5 + $0xa8] sm:$0xff]  }
 0x331   : > { %v2310_v50 = vpop.f32.mrf.mxu1 }
 0x332   : > { %v4609_v50 = vld [vmem:[%s5800_s5 + $0xa0] sm:$0xff]  }
 0x333   : > { %v2311_v37 = vpop.f32.mrf.mxu1 }
 0x334   : > { %v4610_v37 = vld [vmem:[%s5800_s5 + $0xe0] sm:$0xff]  }
 0x335   : > { %v2312_v52 = vpop.f32.mrf.mxu1 }
 0x336   : > { %v4611_v52 = vld [vmem:[%s5800_s5 + $0x98] sm:$0xff]  }
 0x339   : > { %v2170_v1 = vpop.f32.mrf.mxu0 }
 0x33a   : > { %v2176_v12 = vadd.f32 %v2170_v1, %v1771_v32  ;;  %v4612_v1 = vld [vmem:[%s5800_s5 + $0xd8] sm:$0xff]  }
 0x33b   : > { %v2172_v14 = vpop.f32.mrf.mxu0 }
 0x33c   : > { %v4614_v14 = vld [vmem:[%s5800_s5 + $0xd0] sm:$0xff]  }
 0x33d   : > { %v2173_v16 = vpop.f32.mrf.mxu0 }
 0x33e   : > { %v4615_v16 = vld [vmem:[%s5800_s5 + $0x88] sm:$0xff]  }
 0x33f   : > { %v2174_v18 = vpop.f32.mrf.mxu0 }
 0x340   : > { %v4616_v18 = vld [vmem:[%s5800_s5 + $0xc8] sm:$0xff]  }
 0x35f   : > { %v2610_v15 = vpop.f32.mrf.mxu1 }
 0x360   : > { %v2616_v56 = vadd.f32 %v2610_v15, %v2314_v35  ;;  %v4608_v35 = vld [vmem:[%s5800_s5 + $0xe8] sm:$0xff]   ;;  %v4617_v15 = vld [vmem:[%s5800_s5 + $0x80] sm:$0xff]  }
 0x361   : > { %v2612_v34 = vpop.f32.mrf.mxu1 }
 0x362   : > { %v4618_v34 = vld [vmem:[%s5800_s5 + $0xc0] sm:$0xff]  }
 0x363   : > { %v2613_v53 = vpop.f32.mrf.mxu1 }
 0x365   : > { %v2614_v9 = vpop.f32.mrf.mxu1 }
 0x369   : > { %v2472_v2 = vpop.f32.mrf.mxu0 }
 0x36a   : > { %v2478_v57 = vadd.f32 %v2472_v2, %v2176_v12  ;;  %v4613_v12 = vld [vmem:[%s5800_s5 + $0x90] sm:$0xff]  }
 0x36b   : > { %v2474_v19 = vpop.f32.mrf.mxu0 }
 0x36d   : > { %v2475_v20 = vpop.f32.mrf.mxu0 }
 0x36e   : > { %v4619_v20 = vld [vmem:[%s5802_s7 + $0x18] sm:$0xff]  }
 0x36f   : > { %v2476_v25 = vpop.f32.mrf.mxu0 }
 0x370   : > { %v4620_v25 = vld [vmem:[%s5802_s7 + $0x10] sm:$0xff]  }
 0x38f   : > { %v2900_v54 = vpop.f32.mrf.mxu1 }
 0x390   : > { %v2906_v22 = vadd.f32 %v2900_v54, %v2616_v56  ;;  %v4621_v54 = vld [vmem:[%s5802_s7 + $0x8] sm:$0xff]  }
 0x391   : > { %v2902_v4 = vpop.f32.mrf.mxu1 }
 0x392   : > { %v4622_v4 = vld [vmem:[%s5802_s7] sm:$0xff]  }
 0x393   : > { %v2903_v21 = vpop.f32.mrf.mxu1 }
 0x395   : > { %v2904_v55 = vpop.f32.mrf.mxu1 }
 0x399   : > { %v2762_v51 = vpop.f32.mrf.mxu0 }
 0x39a   : > { %v2768_v6 = vadd.f32 %v2762_v51, %v2478_v57 }
 0x39b   : > { %v2764_v38 = vpop.f32.mrf.mxu0 }
 0x39c   : > { %v2907_v7 = vmax.f32 %v2768_v6, %v2906_v22 }
 0x39d   : > { %v2765_v8 = vpop.f32.mrf.mxu0 }
 0x39e   : > { %4260 = vmatpush3.msra.mxu0 %v2907_v7  ;;  %4265 = vmatpush3.msra.mxu1 %v2907_v7  ;;  %v3064_v7 = vld [vmem:[%s5801_s6] sm:$0x1] }
 0x39f   : > { %v2766_v40 = vpop.f32.mrf.mxu0  ;;  %4262 = vmatmul.mubr.msk.f32.vlgmr.msra.gmra.mxu0 %vm2908_vm10, %v5070_v28  ;;  %4267 = vmatmul.mubr.msk.f32.vlgmr.msra.gmra.mxu1 %vm2908_vm10, %v5073_v31  ;;  %v4591_v28 = vld [vmem:[%s5800_s5 + $0x28] sm:$0xff]  }
 0x3a0   : > { %4269 = vmatprep.subr.bf16.mxu0 %v5813_v3  ;;  %4289 = vmatprep.subr.bf16.mxu1 %v5813_v3  ;;  %v4592_v31 = vld [vmem:[%s5800_s5 + $0x68] sm:$0xff]  }
 0x3a1   : > { %4270 = vmatpush3.bf16.msra.mxu0 %v4587_v10  ;;  %4290 = vmatpush3.bf16.msra.mxu1 %v4588_v42 }
 0x3a2   : > { %4271 = vmatprep.subr.bf16.mxu0 %v5813_v3  ;;  %4291 = vmatprep.subr.bf16.mxu1 %v5813_v3 }
 0x3a3   : > { %4285 = vmatprep.mubr.msk.bf16.mxu0 %vm4691_vm9, %v5813_v3  ;;  %4305 = vmatprep.mubr.msk.bf16.mxu1 %vm4691_vm9, %v5813_v3 }
 0x3a5   : > { %4272 = vmatpush3.bf16.msra.mxu0 %v4589_v24  ;;  %4292 = vmatpush3.bf16.msra.mxu1 %v4590_v43 }
 0x3a6   : > { %4273 = vmatprep.subr.bf16.mxu0 %v5813_v3  ;;  %4293 = vmatprep.subr.bf16.mxu1 %v5813_v3 }
 0x3a9   : > { %4274 = vmatpush3.bf16.msra.mxu0 %v4591_v28  ;;  %4294 = vmatpush3.bf16.msra.mxu1 %v4592_v31 }
 0x3aa   : > { %4275 = vmatprep.subr.bf16.mxu0 %v5813_v3  ;;  %4295 = vmatprep.subr.bf16.mxu1 %v5813_v3 }
 0x3ad   : > { %4276 = vmatpush3.bf16.msra.mxu0 %v4593_v26  ;;  %4296 = vmatpush3.bf16.msra.mxu1 %v4594_v44 }
 0x3ae   : > { %4277 = vmatprep.subr.bf16.mxu0 %v5813_v3  ;;  %4297 = vmatprep.subr.bf16.mxu1 %v5813_v3 }
 0x3b1   : > { %4278 = vmatpush3.bf16.msra.mxu0 %v4595_v58  ;;  %4298 = vmatpush3.bf16.msra.mxu1 %v4596_v27 }
 0x3b2   : > { %4279 = vmatprep.subr.bf16.mxu0 %v5813_v3  ;;  %4299 = vmatprep.subr.bf16.mxu1 %v5813_v3 }
 0x3b5   : > { %4280 = vmatpush3.bf16.msra.mxu0 %v4597_v45  ;;  %4300 = vmatpush3.bf16.msra.mxu1 %v4598_v39  ;;  %v3506_v39 = vld [vmem:[%s5803_s8] sm:$0x1] }
 0x3b6   : > { %4281 = vmatprep.subr.bf16.mxu0 %v5813_v3  ;;  %4301 = vmatprep.subr.bf16.mxu1 %v5813_v3 }
 0x3b9   : > { %4282 = vmatpush3.bf16.msra.mxu0 %v4599_v41  ;;  %4302 = vmatpush3.bf16.msra.mxu1 %v4600_v29 }
 0x3ba   : > { %4283 = vmatprep.subr.bf16.mxu0 %v5813_v3  ;;  %4303 = vmatprep.subr.bf16.mxu1 %v5813_v3 }
 0x3bd   : > { %4284 = vmatpush3.bf16.msra.mxu0 %v4601_v46  ;;  %4304 = vmatpush3.bf16.msra.mxu1 %v4602_v59 }
 0x3be   : > { %4309 = vmatprep.subr.bf16.mxu0 %v5813_v3  ;;  %4329 = vmatprep.subr.bf16.mxu1 %v5813_v3 }
 0x45f   : > { %v2977_v60 = vpop.f32.mrf.mxu0  ;;  %v3049_v11 = vpop.f32.mrf.mxu1 }
 0x460   : > { %v3053_v32 = vmax.f32 %v2977_v60, %v3049_v11 }
 0x461   : > { %v4263_v5 = vpop.f32.mrf.mxu0  ;;  %v4268_v13 = vpop.f32.mrf.mxu1 }
 0x462   : > { %v3061_v33 = vadd.f32 %v4124_v30, %v3053_v32 }
 0x464   : > { %v3062_v47 = vmax.f32 %v3061_v33, 0.0 }
 0x466   : > { %3063 = vst [vmem:[#allocation3] sm:$0xf] %v3062_v47 }
 0x46d   : > { %v3065_v49 = vld [vmem:[#allocation3] sm:$0x1]  ;;  %v3172_v61 = vld [vmem:[#allocation3 + $0x1] sm:$0x1]  ;;  %v3280_v53 = vld [vmem:[#allocation3 + $0x2] sm:$0x1] }
 0x46e   : > { %v3066_v63 = vpack.c.bf16 %v3065_v49, %v3065_v49  ;;  %v3173_v0 = vpack.c.bf16 %v3172_v61, %v3172_v61  ;;  %v3388_v9 = vld [vmem:[#allocation3 + $0x3] sm:$0x1]  ;;  %v3281_v2 = vpack.c.bf16 %v3280_v53, %v3280_v53 }
 0x46f   : > { %v3389_v19 = vpack.c.bf16 %v3388_v9, %v3388_v9 }
 0x470   : > { %4286 = vmatmul.mubr.bf16.vlgmr.msra.gmra.mxu0 %v3066_v63  ;;  %4306 = vmatmul.mubr.bf16.vlgmr.msra.gmra.mxu1 %v3173_v0 }
 0x471   : > { %4310 = vmatpush3.bf16.msra.mxu0 %v4603_v48  ;;  %4330 = vmatpush3.bf16.msra.mxu1 %v4604_v62 }
 0x472   : > { %4311 = vmatprep.subr.bf16.mxu0 %v5813_v3  ;;  %4331 = vmatprep.subr.bf16.mxu1 %v5813_v3 }
 0x473   : > { %4325 = vmatprep.mubr.msk.bf16.mxu0 %vm4691_vm9, %v5813_v3  ;;  %4345 = vmatprep.mubr.msk.bf16.mxu1 %vm4691_vm9, %v5813_v3 }
 0x475   : > { %4312 = vmatpush3.bf16.msra.mxu0 %v4605_v17  ;;  %4332 = vmatpush3.bf16.msra.mxu1 %v4606_v36 }
 0x476   : > { %4313 = vmatprep.subr.bf16.mxu0 %v5813_v3  ;;  %4333 = vmatprep.subr.bf16.mxu1 %v5813_v3 }
 0x479   : > { %4314 = vmatpush3.bf16.msra.mxu0 %v4607_v23  ;;  %4334 = vmatpush3.bf16.msra.mxu1 %v4608_v35 }
 0x47a   : > { %4315 = vmatprep.subr.bf16.mxu0 %v5813_v3  ;;  %4335 = vmatprep.subr.bf16.mxu1 %v5813_v3 }
 0x47d   : > { %4316 = vmatpush3.bf16.msra.mxu0 %v4609_v50  ;;  %4336 = vmatpush3.bf16.msra.mxu1 %v4610_v37 }
 0x47e   : > { %4317 = vmatprep.subr.bf16.mxu0 %v5813_v3  ;;  %4337 = vmatprep.subr.bf16.mxu1 %v5813_v3 }
 0x481   : > { %4318 = vmatpush3.bf16.msra.mxu0 %v4611_v52  ;;  %4338 = vmatpush3.bf16.msra.mxu1 %v4612_v1 }
 0x482   : > { %4319 = vmatprep.subr.bf16.mxu0 %v5813_v3  ;;  %4339 = vmatprep.subr.bf16.mxu1 %v5813_v3 }
 0x485   : > { %4320 = vmatpush3.bf16.msra.mxu0 %v4613_v12  ;;  %4340 = vmatpush3.bf16.msra.mxu1 %v4614_v14 }
 0x486   : > { %4321 = vmatprep.subr.bf16.mxu0 %v5813_v3  ;;  %4341 = vmatprep.subr.bf16.mxu1 %v5813_v3 }
 0x489   : > { %4322 = vmatpush3.bf16.msra.mxu0 %v4615_v16  ;;  %4342 = vmatpush3.bf16.msra.mxu1 %v4616_v18 }
 0x48a   : > { %4323 = vmatprep.subr.bf16.mxu0 %v5813_v3  ;;  %4343 = vmatprep.subr.bf16.mxu1 %v5813_v3 }
 0x48d   : > { %4324 = vmatpush3.bf16.msra.mxu0 %v4617_v15  ;;  %4344 = vmatpush3.bf16.msra.mxu1 %v4618_v34 }
 0x48e   : > { %4349 = vmatprep.subr.bf16.mxu0 %v5813_v3 }
 0x490   : > { %4326 = vmatmul.mubr.bf16.vlgmr.msra.gmra.mxu0 %v3281_v2  ;;  %4346 = vmatmul.mubr.bf16.vlgmr.msra.gmra.mxu1 %v3389_v19 }
 0x491   : > { %4357 = vmatprep.mubr.msk.bf16.mxu0 %vm4691_vm9, %v5813_v3  ;;  %4350 = vmatpush3.bf16.msra.mxu0 %v4619_v20 }
 0x492   : > { %4351 = vmatprep.subr.bf16.mxu0 %v5813_v3 }
 0x495   : > { %4352 = vmatpush3.bf16.msra.mxu0 %v4620_v25 }
 0x496   : > { %4353 = vmatprep.subr.bf16.mxu0 %v5813_v3 }
 0x499   : > { %4354 = vmatpush3.bf16.msra.mxu0 %v4621_v54 }
 0x49a   : > { %4355 = vmatprep.subr.bf16.mxu0 %v5813_v3 }
 0x49d   : > { %4356 = vmatpush3.bf16.msra.mxu0 %v4622_v4 }
 0x530   : > { %v3165_v21 = vpop.f32.mrf.mxu0  ;;  %v3273_v55 = vpop.f32.mrf.mxu1 }
 0x531   : > { %v3171_v8 = vadd.f32 %v3165_v21, %v3064_v7 }
 0x532   : > { %v4287_v56 = vpop.f32.mrf.mxu0  ;;  %v4307_v57 = vpop.f32.mrf.mxu1 }
 0x533   : > { %v3279_v10 = vadd.f32 %v3273_v55, %v3171_v8 }
 0x534   : > { %v3168_v51 = vpop.f32.mrf.mxu0  ;;  %v3276_v22 = vpop.f32.mrf.mxu1 }
 0x536   : > { %v4288_v6 = vpop.f32.mrf.mxu0  ;;  %v4308_v38 = vpop.f32.mrf.mxu1 }
 0x550   : > { %v3381_v3 = vpop.f32.mrf.mxu0  ;;  %v3489_v42 = vpop.f32.mrf.mxu1 }
 0x551   : > { %v3387_v40 = vadd.f32 %v3381_v3, %v3279_v10 }
 0x552   : > { %v4327_v24 = vpop.f32.mrf.mxu0  ;;  %v4347_v43 = vpop.f32.mrf.mxu1 }
 0x553   : > { %v3495_v28 = vadd.f32 %v3489_v42, %v3387_v40 }
 0x554   : > { %v3384_v31 = vpop.f32.mrf.mxu0  ;;  %v3492_v26 = vpop.f32.mrf.mxu1 }
 0x555   : > { %v3496_v44 = vmax.f32 %v3495_v28, 0.0 }
 0x556   : > { %v4328_v58 = vpop.f32.mrf.mxu0  ;;  %v4348_v27 = vpop.f32.mrf.mxu1 }
 0x557   : > { %v3497_v45 = vpack.c.bf16 %v3496_v44, %v3496_v44 }
 0x559   : > { %4358 = vmatmul.mubr.msk.bf16.vlgmr.msra.gmra.mxu0 %vm1442_vm7, %v3497_v45 }
 0x619   : > { %v3568_v41 = vpop.f32.mrf.mxu0 }
 0x61a   : > { %v3569_v29 = vadd.f32 %v3568_v41, %v3506_v39 }
 0x61b   : > { %v4359_v46 = vpop.f32.mrf.mxu0 }
 0x61c   : > { %v3575_v59 = vsel %vm3574_vm11, %v3569_v29, -inf }
 0x61d   : > { %3576 = vmax.xlane.f32.xlu0 %v3575_v59  ;;  %v3571_v60 = vpop.f32.mrf.mxu0 }
 0x61f   : > { %v4360_v11 = vpop.f32.mrf.mxu0 }
 0x6a6   : > { %v3577_v30 = vpop.xlane.xlu0 %3576 }
 0x6a7   : > { %v3578_v32 = vsub.f32 %v3569_v29, %v3577_v30 }
 0x6a9   : > { %v3579_v5 = vmul.f32 1.442695, %v3578_v32 }
 0x6ab   : > { %4623 = vpow2.f32 %v3579_v5 }
 0x6b8   : > { %v4624_v13 = vpop.eup %4623 }
 0x6b9   : > { %v3581_v33 = vsel %vm3574_vm11, %v4624_v13, 0.0 }
 0x6ba   : > { %3582 = vadd.xlane.f32.xlu0 %v3581_v33 }
 0x743   : > { %v3583_v47 = vpop.xlane.xlu0 %3582 }
 0x744   : > { %4625 = vlog2.f32 %v3583_v47 }
 0x751   : > { %v4626_v48 = vpop.eup %4625 }
 0x752   : > { %v3585_v49 = vmul.f32 0.6931472, %v4626_v48 }
 0x754   : > { %v3586_v61 = vsub.f32 %v3578_v32, %v3585_v49 }
 0x756   : > { %3587 = vst [vmem:[%s324_s25] sm:$0x1] %v3586_v61 }
 0x757   : > { %4640 = shalt.err (!%p4637_p3)
}
 0x758   : > { %s4641_s22 = scalar_lea.hbm %s3599_s28, 16  ;;  %s4645_s25 = scalar_lea.hbm %s5804_s9, 32 }
 0x759   : > { %p4642_p4 = scmp.ne.s32.totalorder %s3599_s28, %s4641_s22  ;;  %p4646_p9 = scmp.lt.s32.totalorder %s3599_s28, %s5804_s9 }
 0x75a   : > { %p4647_p10 = scmp.lt.s32.totalorder %s4645_s25, %s4641_s22 }
 0x75b   : > { %p4643_p7 = pnand %p4642_p4, %p4781_p5 }
 0x75c   : > { %p4648_p11 = por %p4647_p10, %p4646_p9 }
 0x75d   : > { %p4644_p8 = pneg %p4643_p7 }
 0x75f   : > { %p4649_p12 = pnand %p4648_p11, %p4644_p8 }
 0x761   : > { %4652 = shalt.err (!%p4649_p12)
}
 0x762   : > { %4365 = dma.vmem_to_hbm [thread:$0]  (%p4781_p5), %s3602_s26, 16, %s3599_s28, %s3589_s29  }
 0x763 PF: > { %p4371_p13 = scmp.ge.s32.totalorder %s4687_s12, 2  ;;  %s3613_s16 = sand.u32 1, %s4675_s30  }
 0x764   : > { %s3614_s17 = scalar_lea.sflag [#allocation5], %s3613_s16 }
 0x765   : > { %p4368_p0 = pnand %p4371_p13, %p4785_p6 }
 0x767   : > { %p4369_p1 = pneg %p4368_p0 }
 0x769   : > { %4670 = dma.done.wait (%p4369_p1), %s3614_s17, 16  }
 0x76a   : > { %4672 = vsyncadd (%p4369_p1), %s3614_s17, 4294967280  ;;  %p19_p2 = scmp.ge.s32.totalorder %s4768_s15, 4   ;;  %s5815_s30 = smov %s4679_s10 }
 0x76b   : > { %s5816_s10 = smov %s4683_s11  ;;  %s5817_s11 = smov %s4779_s18 }
 0x76c   : > { %s5818_s12 = smov %s4768_s15  ;;  %21 = sbr.rel (!%p19_p2) target bundleno = 3 (0x3), region = 112 }
 0x771   :  { %3618 = vsyncpa [#allocation5], 1 }
 0x772   :  { %3620 = vsyncpa [#allocation5 + $0x1], 1 }

</bundles_post_ra>
